<compile_context>
chip_gen: v7x
topology: tpu7x:2x2x1
jax: 0.10.0
libtpu: 0.0.40
codegen_flags: <defaults>
</compile_context>

<pallas_src>
import jax
import jax.numpy as jnp
from jax import lax
from jax.experimental import pallas as pl
from jax.experimental.pallas import tpu as pltpu

MXU_DTYPE = jnp.bfloat16  # MXU operand dtype; all elementwise math stays f32.


# ---------------------------------------------------------------------------
# Fused BasicBlock kernel: 4 x (conv3x3 + folded-BN + ReLU) + residual + ReLU
# ---------------------------------------------------------------------------
def _make_basic_block_kernel(images_per_step, H, W):
    N = H * W  # spatial lives on the lane axis -> lane-dense matmuls & stores

    def kernel(x_ref,
               w1a_ref, s1a_ref, w1b_ref, s1b_ref,
               w2a_ref, s2a_ref, w2b_ref, s2b_ref,
               o_ref):
        # x_ref : (Bt, cin, N)   f32   channels on sublanes, H*W on lanes
        # w*_ref: (9, cout, cin) bf16  3x3 taps, t = (dy+1)*3 + (dx+1), BN scale folded
        # s*_ref: (cout, 1)      f32   BN shift (conv bias + running mean folded in)
        # o_ref : (Bt, cout, N)  f32

        # Halo masks: which lane positions p = h*W + w have a valid (h+dy, w+dx)
        # source.  Shared by all four conv stages and all images in this block.
        # (Float arithmetic only -- avoids vector integer div/mod on the VPU.)
        lane = lax.broadcasted_iota(jnp.int32, (1, N), 1).astype(jnp.float32)
        row_all = jnp.floor((lane + 0.5) / W)              # global row index
        col = lane - row_all * W                           # column within row
        row = row_all - jnp.floor((row_all + 0.5) / H) * H  # row within image
        masks = {}
        for dy in (-1, 0, 1):
            for dx in (-1, 0, 1):
                masks[(dy, dx)] = ((row + dy >= 0) & (row + dy <= H - 1) &
                                   (col + dx >= 0) & (col + dx <= W - 1))

        def conv3x3_bn_relu(x, w_ref, s_ref):
            # x: (cin, N) f32 -> (cout, N) f32
            # Each 3x3 tap is a circular lane roll of the flat image by
            # -(dy*W + dx) with out-of-image lanes masked to zero: no padded
            # scratch, no misaligned slices, no wasted halo columns.
            cout = w_ref.shape[1]
            acc = jnp.zeros((cout, N), jnp.float32)
            for dy in (-1, 0, 1):
                for dx in (-1, 0, 1):
                    t = (dy + 1) * 3 + (dx + 1)
                    s = dy * W + dx
                    if s == 0:
                        tap = x
                    else:
                        tap = pltpu.roll(x, shift=(-s) % N, axis=1)
                        tap = jnp.where(masks[(dy, dx)], tap, 0.0)
                    # M=cout, K=cin (small at these channel counts), N=H*W=256:
                    # full-width MXU pass, lane-dense f32 accumulator.
                    acc = acc + jnp.dot(w_ref[t], tap.astype(MXU_DTYPE),
                                        preferred_element_type=jnp.float32)
            # Folded BN: scale already in the weights; only shift + ReLU here.
            return jnp.maximum(acc + s_ref[...], 0.0)

        # TODO(synk): for realistic channel counts (planes ~ 64+), accumulate in
        # a VMEM scratch and collapse the 9 taps into a single K=9*cin matmul.
        for b in range(images_per_step):
            x = x_ref[b].astype(jnp.float32)
            y = conv3x3_bn_relu(x, w1a_ref, s1a_ref)          # double_conv1 / a
            residual = conv3x3_bn_relu(y, w1b_ref, s1b_ref)   # double_conv1 / b
            y = conv3x3_bn_relu(residual, w2a_ref, s2a_ref)   # double_conv2 / a
            y = conv3x3_bn_relu(y, w2b_ref, s2b_ref)          # double_conv2 / b
            o_ref[b] = jnp.maximum(y + residual, 0.0).astype(o_ref.dtype)

    return kernel


def _images_per_step(batch, bytes_per_image):
    # Amortize per-grid-step overhead with bigger input blocks, but keep >= 2
    # grid steps when possible so both v7x TensorCores get work and pipeline.
    target = max(1, (512 * 1024) // max(1, bytes_per_image))
    bt = max(1, min(batch, target, max(1, batch // 2)))
    while batch % bt:
        bt -= 1
    return bt


def basic_block_forward(kparams, x):
    """x: (B, inplanes, H, W) float32 NCHW (same layout as the PyTorch module)."""
    B, cin, H, W = x.shape
    N = H * W
    cout = kparams["w_conv2b"].shape[1]

    bt = _images_per_step(B, cin * N * x.dtype.itemsize)
    grid = (B // bt,)

    # NCHW already has channels-on-sublanes / spatial-on-lanes: just merge H, W.
    x_flat = x.reshape(B, cin, N)

    def full(arr):
        r = arr.ndim
        return pl.BlockSpec(arr.shape, lambda i: (0,) * r)

    out = pl.pallas_call(
        _make_basic_block_kernel(bt, H, W),
        out_shape=jax.ShapeDtypeStruct((B, cout, N), jnp.float32),
        grid=grid,
        in_specs=[
            pl.BlockSpec((bt, cin, N), lambda i: (i, 0, 0)),
            full(kparams["w_conv1a"]), full(kparams["s_conv1a"]),
            full(kparams["w_conv1b"]), full(kparams["s_conv1b"]),
            full(kparams["w_conv2a"]), full(kparams["s_conv2a"]),
            full(kparams["w_conv2b"]), full(kparams["s_conv2b"]),
        ],
        out_specs=pl.BlockSpec((bt, cout, N), lambda i: (i, 0, 0)),
        compiler_params=pltpu.CompilerParams(
            dimension_semantics=("parallel",),
        ),
    )(x_flat,
      kparams["w_conv1a"], kparams["s_conv1a"],
      kparams["w_conv1b"], kparams["s_conv1b"],
      kparams["w_conv2a"], kparams["s_conv2a"],
      kparams["w_conv2b"], kparams["s_conv2b"])

    return out.reshape(B, cout, H, W)


# ---------------------------------------------------------------------------
# Parameter init (deterministic, synthetic) with eval-mode BN folding
# ---------------------------------------------------------------------------
def _init_conv_bn(key, cin, cout, eps=1e-5):
    kw, kb, kg, kbe, km, kv = jax.random.split(key, 6)
    w = 0.1 * jax.random.normal(kw, (cout, cin, 3, 3), jnp.float32)  # OIHW
    bias = 0.1 * jax.random.normal(kb, (cout,), jnp.float32)
    gamma = 1.0 + 0.1 * jax.random.normal(kg, (cout,), jnp.float32)
    beta = 0.1 * jax.random.normal(kbe, (cout,), jnp.float32)
    mean = 0.1 * jax.random.normal(km, (cout,), jnp.float32)
    var = 0.5 + jax.random.uniform(kv, (cout,), jnp.float32)
    raw = dict(w=w, bias=bias, gamma=gamma, beta=beta, mean=mean, var=var, eps=eps)

    # Eval-mode BN folded at init:   y = conv(x; w * scale) + shift
    scale = gamma / jnp.sqrt(var + eps)
    w_folded = w * scale[:, None, None, None]
    shift = beta + (bias - mean) * scale
    w_kernel = jnp.transpose(w_folded, (2, 3, 0, 1)).reshape(9, cout, cin)
    return raw, w_kernel.astype(MXU_DTYPE), shift.reshape(cout, 1)


def init_basic_block(key, inplanes, planes):
    stages = (("conv1a", inplanes, planes), ("conv1b", planes, planes),
              ("conv2a", planes, planes), ("conv2b", planes, planes))
    raw_params, kernel_params = {}, {}
    for k, (name, ci, co) in zip(jax.random.split(key, len(stages)), stages):
        raw, w, s = _init_conv_bn(k, ci, co)
        raw_params[name] = raw
        kernel_params["w_" + name] = w
        kernel_params["s_" + name] = s
    return raw_params, kernel_params


# ---------------------------------------------------------------------------
# Pure-JAX f32 reference (mirrors the PyTorch module, eval-mode BN)
# ---------------------------------------------------------------------------
def _ref_stage(x, p):
    y = lax.conv_general_dilated(x, p["w"], (1, 1), ((1, 1), (1, 1)),
                                 dimension_numbers=("NCHW", "OIHW", "NCHW"))
    y = y + p["bias"][None, :, None, None]
    y = (y - p["mean"][None, :, None, None]) / jnp.sqrt(p["var"] + p["eps"])[None, :, None, None]
    y = y * p["gamma"][None, :, None, None] + p["beta"][None, :, None, None]
    return jnp.maximum(y, 0.0)


def basic_block_reference(raw_params, x):
    y = _ref_stage(_ref_stage(x, raw_params["conv1a"]), raw_params["conv1b"])
    out = _ref_stage(_ref_stage(y, raw_params["conv2a"]), raw_params["conv2b"])
    return jnp.maximum(out + y, 0.0)


# ---------------------------------------------------------------------------
if __name__ == "__main__":
    key = jax.random.PRNGKey(0)
    kp, kx = jax.random.split(key)

    B, inplanes, planes, H, W = 2, 4, 4, 16, 16
    raw_params, kernel_params = init_basic_block(kp, inplanes, planes)
    x = jax.random.normal(kx, (B, inplanes, H, W), jnp.float32)

    y = jax.jit(basic_block_forward)(kernel_params, x)
    jax.block_until_ready(y)

    assert y.shape == (B, planes, H, W), y.shape
    assert bool(jnp.isfinite(y).all())

    # Validate against the pure-JAX f32 reference (bf16 MXU operands -> tolerance).
    y_ref = basic_block_reference(raw_params, x)
    assert bool(jnp.allclose(y, y_ref, rtol=5e-2, atol=5e-2)), (
        "max abs err = %f" % float(jnp.max(jnp.abs(y - y_ref))))

    print("KERNEL_OK")
</pallas_src>

<mosaic_0001>
module attributes {stable_mosaic.version = 11 : i64} {
  func.func @kernel(%arg0: i32, %arg1: memref<1x4x256xf32, #tpu.memory_space<vmem>>, %arg2: memref<9x4x4xbf16, #tpu.memory_space<vmem>>, %arg3: memref<4x1xf32, #tpu.memory_space<vmem>>, %arg4: memref<9x4x4xbf16, #tpu.memory_space<vmem>>, %arg5: memref<4x1xf32, #tpu.memory_space<vmem>>, %arg6: memref<9x4x4xbf16, #tpu.memory_space<vmem>>, %arg7: memref<4x1xf32, #tpu.memory_space<vmem>>, %arg8: memref<9x4x4xbf16, #tpu.memory_space<vmem>>, %arg9: memref<4x1xf32, #tpu.memory_space<vmem>>, %arg10: memref<1x4x256xf32, #tpu.memory_space<vmem>>) attributes {dimension_semantics = [#tpu.dimension_semantics<parallel>], iteration_bounds = array<i64: 2>, scalar_prefetch = 0 : i64, scratch_operands = 0 : i64, tpu.core_type = #tpu.core_type<tc>, window_params = [{transform_indices = @transform_0, window_bounds = array<i64: 1, 4, 256>}, {pipeline_mode = #tpu.pipeline_mode<synchronous>, transform_indices = @transform_1, window_bounds = array<i64: 9, 4, 4>}, {pipeline_mode = #tpu.pipeline_mode<synchronous>, transform_indices = @transform_2, window_bounds = array<i64: 4, 1>}, {pipeline_mode = #tpu.pipeline_mode<synchronous>, transform_indices = @transform_3, window_bounds = array<i64: 9, 4, 4>}, {pipeline_mode = #tpu.pipeline_mode<synchronous>, transform_indices = @transform_4, window_bounds = array<i64: 4, 1>}, {pipeline_mode = #tpu.pipeline_mode<synchronous>, transform_indices = @transform_5, window_bounds = array<i64: 9, 4, 4>}, {pipeline_mode = #tpu.pipeline_mode<synchronous>, transform_indices = @transform_6, window_bounds = array<i64: 4, 1>}, {pipeline_mode = #tpu.pipeline_mode<synchronous>, transform_indices = @transform_7, window_bounds = array<i64: 9, 4, 4>}, {pipeline_mode = #tpu.pipeline_mode<synchronous>, transform_indices = @transform_8, window_bounds = array<i64: 4, 1>}, {transform_indices = @transform_9, window_bounds = array<i64: 1, 4, 256>}]} {
    %0 = tpu.iota {dimensions = array<i32: 1>} : vector<1x256xi32>
    %1 = arith.sitofp %0 : vector<1x256xi32> to vector<1x256xf32>
    %cst = arith.constant 5.000000e-01 : f32
    %2 = vector.broadcast %cst : f32 to vector<1x256xf32>
    %3 = arith.addf %1, %2 : vector<1x256xf32>
    %cst_0 = arith.constant 1.600000e+01 : f32
    %4 = vector.broadcast %cst_0 : f32 to vector<1x256xf32>
    %5 = arith.divf %3, %4 : vector<1x256xf32>
    %6 = math.floor %5 : vector<1x256xf32>
    %cst_1 = arith.constant 1.600000e+01 : f32
    %7 = vector.broadcast %cst_1 : f32 to vector<1x256xf32>
    %8 = arith.mulf %6, %7 : vector<1x256xf32>
    %9 = arith.subf %1, %8 : vector<1x256xf32>
    %cst_2 = arith.constant 5.000000e-01 : f32
    %10 = vector.broadcast %cst_2 : f32 to vector<1x256xf32>
    %11 = arith.addf %6, %10 : vector<1x256xf32>
    %cst_3 = arith.constant 1.600000e+01 : f32
    %12 = vector.broadcast %cst_3 : f32 to vector<1x256xf32>
    %13 = arith.divf %11, %12 : vector<1x256xf32>
    %14 = math.floor %13 : vector<1x256xf32>
    %cst_4 = arith.constant 1.600000e+01 : f32
    %15 = vector.broadcast %cst_4 : f32 to vector<1x256xf32>
    %16 = arith.mulf %14, %15 : vector<1x256xf32>
    %17 = arith.subf %6, %16 : vector<1x256xf32>
    %cst_5 = arith.constant -1.000000e+00 : f32
    %18 = vector.broadcast %cst_5 : f32 to vector<1x256xf32>
    %19 = arith.addf %17, %18 : vector<1x256xf32>
    %cst_6 = arith.constant 0.000000e+00 : f32
    %20 = vector.broadcast %cst_6 : f32 to vector<1x256xf32>
    %21 = arith.cmpf oge, %19, %20 : vector<1x256xf32>
    %cst_7 = arith.constant -1.000000e+00 : f32
    %22 = vector.broadcast %cst_7 : f32 to vector<1x256xf32>
    %23 = arith.addf %17, %22 : vector<1x256xf32>
    %cst_8 = arith.constant 1.500000e+01 : f32
    %24 = vector.broadcast %cst_8 : f32 to vector<1x256xf32>
    %25 = arith.cmpf ole, %23, %24 : vector<1x256xf32>
    %26 = arith.andi %21, %25 : vector<1x256xi1>
    %cst_9 = arith.constant -1.000000e+00 : f32
    %27 = vector.broadcast %cst_9 : f32 to vector<1x256xf32>
    %28 = arith.addf %9, %27 : vector<1x256xf32>
    %cst_10 = arith.constant 0.000000e+00 : f32
    %29 = vector.broadcast %cst_10 : f32 to vector<1x256xf32>
    %30 = arith.cmpf oge, %28, %29 : vector<1x256xf32>
    %31 = arith.andi %26, %30 : vector<1x256xi1>
    %cst_11 = arith.constant -1.000000e+00 : f32
    %32 = vector.broadcast %cst_11 : f32 to vector<1x256xf32>
    %33 = arith.addf %9, %32 : vector<1x256xf32>
    %cst_12 = arith.constant 1.500000e+01 : f32
    %34 = vector.broadcast %cst_12 : f32 to vector<1x256xf32>
    %35 = arith.cmpf ole, %33, %34 : vector<1x256xf32>
    %36 = arith.andi %31, %35 : vector<1x256xi1>
    %cst_13 = arith.constant -1.000000e+00 : f32
    %37 = vector.broadcast %cst_13 : f32 to vector<1x256xf32>
    %38 = arith.addf %17, %37 : vector<1x256xf32>
    %cst_14 = arith.constant 0.000000e+00 : f32
    %39 = vector.broadcast %cst_14 : f32 to vector<1x256xf32>
    %40 = arith.cmpf oge, %38, %39 : vector<1x256xf32>
    %cst_15 = arith.constant -1.000000e+00 : f32
    %41 = vector.broadcast %cst_15 : f32 to vector<1x256xf32>
    %42 = arith.addf %17, %41 : vector<1x256xf32>
    %cst_16 = arith.constant 1.500000e+01 : f32
    %43 = vector.broadcast %cst_16 : f32 to vector<1x256xf32>
    %44 = arith.cmpf ole, %42, %43 : vector<1x256xf32>
    %45 = arith.andi %40, %44 : vector<1x256xi1>
    %cst_17 = arith.constant 0.000000e+00 : f32
    %46 = vector.broadcast %cst_17 : f32 to vector<1x256xf32>
    %47 = arith.addf %9, %46 : vector<1x256xf32>
    %cst_18 = arith.constant 0.000000e+00 : f32
    %48 = vector.broadcast %cst_18 : f32 to vector<1x256xf32>
    %49 = arith.cmpf oge, %47, %48 : vector<1x256xf32>
    %50 = arith.andi %45, %49 : vector<1x256xi1>
    %cst_19 = arith.constant 0.000000e+00 : f32
    %51 = vector.broadcast %cst_19 : f32 to vector<1x256xf32>
    %52 = arith.addf %9, %51 : vector<1x256xf32>
    %cst_20 = arith.constant 1.500000e+01 : f32
    %53 = vector.broadcast %cst_20 : f32 to vector<1x256xf32>
    %54 = arith.cmpf ole, %52, %53 : vector<1x256xf32>
    %55 = arith.andi %50, %54 : vector<1x256xi1>
    %cst_21 = arith.constant -1.000000e+00 : f32
    %56 = vector.broadcast %cst_21 : f32 to vector<1x256xf32>
    %57 = arith.addf %17, %56 : vector<1x256xf32>
    %cst_22 = arith.constant 0.000000e+00 : f32
    %58 = vector.broadcast %cst_22 : f32 to vector<1x256xf32>
    %59 = arith.cmpf oge, %57, %58 : vector<1x256xf32>
    %cst_23 = arith.constant -1.000000e+00 : f32
    %60 = vector.broadcast %cst_23 : f32 to vector<1x256xf32>
    %61 = arith.addf %17, %60 : vector<1x256xf32>
    %cst_24 = arith.constant 1.500000e+01 : f32
    %62 = vector.broadcast %cst_24 : f32 to vector<1x256xf32>
    %63 = arith.cmpf ole, %61, %62 : vector<1x256xf32>
    %64 = arith.andi %59, %63 : vector<1x256xi1>
    %cst_25 = arith.constant 1.000000e+00 : f32
    %65 = vector.broadcast %cst_25 : f32 to vector<1x256xf32>
    %66 = arith.addf %9, %65 : vector<1x256xf32>
    %cst_26 = arith.constant 0.000000e+00 : f32
    %67 = vector.broadcast %cst_26 : f32 to vector<1x256xf32>
    %68 = arith.cmpf oge, %66, %67 : vector<1x256xf32>
    %69 = arith.andi %64, %68 : vector<1x256xi1>
    %cst_27 = arith.constant 1.000000e+00 : f32
    %70 = vector.broadcast %cst_27 : f32 to vector<1x256xf32>
    %71 = arith.addf %9, %70 : vector<1x256xf32>
    %cst_28 = arith.constant 1.500000e+01 : f32
    %72 = vector.broadcast %cst_28 : f32 to vector<1x256xf32>
    %73 = arith.cmpf ole, %71, %72 : vector<1x256xf32>
    %74 = arith.andi %69, %73 : vector<1x256xi1>
    %cst_29 = arith.constant 0.000000e+00 : f32
    %75 = vector.broadcast %cst_29 : f32 to vector<1x256xf32>
    %76 = arith.addf %17, %75 : vector<1x256xf32>
    %cst_30 = arith.constant 0.000000e+00 : f32
    %77 = vector.broadcast %cst_30 : f32 to vector<1x256xf32>
    %78 = arith.cmpf oge, %76, %77 : vector<1x256xf32>
    %cst_31 = arith.constant 0.000000e+00 : f32
    %79 = vector.broadcast %cst_31 : f32 to vector<1x256xf32>
    %80 = arith.addf %17, %79 : vector<1x256xf32>
    %cst_32 = arith.constant 1.500000e+01 : f32
    %81 = vector.broadcast %cst_32 : f32 to vector<1x256xf32>
    %82 = arith.cmpf ole, %80, %81 : vector<1x256xf32>
    %83 = arith.andi %78, %82 : vector<1x256xi1>
    %cst_33 = arith.constant -1.000000e+00 : f32
    %84 = vector.broadcast %cst_33 : f32 to vector<1x256xf32>
    %85 = arith.addf %9, %84 : vector<1x256xf32>
    %cst_34 = arith.constant 0.000000e+00 : f32
    %86 = vector.broadcast %cst_34 : f32 to vector<1x256xf32>
    %87 = arith.cmpf oge, %85, %86 : vector<1x256xf32>
    %88 = arith.andi %83, %87 : vector<1x256xi1>
    %cst_35 = arith.constant -1.000000e+00 : f32
    %89 = vector.broadcast %cst_35 : f32 to vector<1x256xf32>
    %90 = arith.addf %9, %89 : vector<1x256xf32>
    %cst_36 = arith.constant 1.500000e+01 : f32
    %91 = vector.broadcast %cst_36 : f32 to vector<1x256xf32>
    %92 = arith.cmpf ole, %90, %91 : vector<1x256xf32>
    %93 = arith.andi %88, %92 : vector<1x256xi1>
    %cst_37 = arith.constant 0.000000e+00 : f32
    %94 = vector.broadcast %cst_37 : f32 to vector<1x256xf32>
    %95 = arith.addf %17, %94 : vector<1x256xf32>
    %cst_38 = arith.constant 0.000000e+00 : f32
    %96 = vector.broadcast %cst_38 : f32 to vector<1x256xf32>
    %97 = arith.cmpf oge, %95, %96 : vector<1x256xf32>
    %cst_39 = arith.constant 0.000000e+00 : f32
    %98 = vector.broadcast %cst_39 : f32 to vector<1x256xf32>
    %99 = arith.addf %17, %98 : vector<1x256xf32>
    %cst_40 = arith.constant 1.500000e+01 : f32
    %100 = vector.broadcast %cst_40 : f32 to vector<1x256xf32>
    %101 = arith.cmpf ole, %99, %100 : vector<1x256xf32>
    %102 = arith.andi %97, %101 : vector<1x256xi1>
    %cst_41 = arith.constant 1.000000e+00 : f32
    %103 = vector.broadcast %cst_41 : f32 to vector<1x256xf32>
    %104 = arith.addf %9, %103 : vector<1x256xf32>
    %cst_42 = arith.constant 0.000000e+00 : f32
    %105 = vector.broadcast %cst_42 : f32 to vector<1x256xf32>
    %106 = arith.cmpf oge, %104, %105 : vector<1x256xf32>
    %107 = arith.andi %102, %106 : vector<1x256xi1>
    %cst_43 = arith.constant 1.000000e+00 : f32
    %108 = vector.broadcast %cst_43 : f32 to vector<1x256xf32>
    %109 = arith.addf %9, %108 : vector<1x256xf32>
    %cst_44 = arith.constant 1.500000e+01 : f32
    %110 = vector.broadcast %cst_44 : f32 to vector<1x256xf32>
    %111 = arith.cmpf ole, %109, %110 : vector<1x256xf32>
    %112 = arith.andi %107, %111 : vector<1x256xi1>
    %cst_45 = arith.constant 1.000000e+00 : f32
    %113 = vector.broadcast %cst_45 : f32 to vector<1x256xf32>
    %114 = arith.addf %17, %113 : vector<1x256xf32>
    %cst_46 = arith.constant 0.000000e+00 : f32
    %115 = vector.broadcast %cst_46 : f32 to vector<1x256xf32>
    %116 = arith.cmpf oge, %114, %115 : vector<1x256xf32>
    %cst_47 = arith.constant 1.000000e+00 : f32
    %117 = vector.broadcast %cst_47 : f32 to vector<1x256xf32>
    %118 = arith.addf %17, %117 : vector<1x256xf32>
    %cst_48 = arith.constant 1.500000e+01 : f32
    %119 = vector.broadcast %cst_48 : f32 to vector<1x256xf32>
    %120 = arith.cmpf ole, %118, %119 : vector<1x256xf32>
    %121 = arith.andi %116, %120 : vector<1x256xi1>
    %cst_49 = arith.constant -1.000000e+00 : f32
    %122 = vector.broadcast %cst_49 : f32 to vector<1x256xf32>
    %123 = arith.addf %9, %122 : vector<1x256xf32>
    %cst_50 = arith.constant 0.000000e+00 : f32
    %124 = vector.broadcast %cst_50 : f32 to vector<1x256xf32>
    %125 = arith.cmpf oge, %123, %124 : vector<1x256xf32>
    %126 = arith.andi %121, %125 : vector<1x256xi1>
    %cst_51 = arith.constant -1.000000e+00 : f32
    %127 = vector.broadcast %cst_51 : f32 to vector<1x256xf32>
    %128 = arith.addf %9, %127 : vector<1x256xf32>
    %cst_52 = arith.constant 1.500000e+01 : f32
    %129 = vector.broadcast %cst_52 : f32 to vector<1x256xf32>
    %130 = arith.cmpf ole, %128, %129 : vector<1x256xf32>
    %131 = arith.andi %126, %130 : vector<1x256xi1>
    %cst_53 = arith.constant 1.000000e+00 : f32
    %132 = vector.broadcast %cst_53 : f32 to vector<1x256xf32>
    %133 = arith.addf %17, %132 : vector<1x256xf32>
    %cst_54 = arith.constant 0.000000e+00 : f32
    %134 = vector.broadcast %cst_54 : f32 to vector<1x256xf32>
    %135 = arith.cmpf oge, %133, %134 : vector<1x256xf32>
    %cst_55 = arith.constant 1.000000e+00 : f32
    %136 = vector.broadcast %cst_55 : f32 to vector<1x256xf32>
    %137 = arith.addf %17, %136 : vector<1x256xf32>
    %cst_56 = arith.constant 1.500000e+01 : f32
    %138 = vector.broadcast %cst_56 : f32 to vector<1x256xf32>
    %139 = arith.cmpf ole, %137, %138 : vector<1x256xf32>
    %140 = arith.andi %135, %139 : vector<1x256xi1>
    %cst_57 = arith.constant 0.000000e+00 : f32
    %141 = vector.broadcast %cst_57 : f32 to vector<1x256xf32>
    %142 = arith.addf %9, %141 : vector<1x256xf32>
    %cst_58 = arith.constant 0.000000e+00 : f32
    %143 = vector.broadcast %cst_58 : f32 to vector<1x256xf32>
    %144 = arith.cmpf oge, %142, %143 : vector<1x256xf32>
    %145 = arith.andi %140, %144 : vector<1x256xi1>
    %cst_59 = arith.constant 0.000000e+00 : f32
    %146 = vector.broadcast %cst_59 : f32 to vector<1x256xf32>
    %147 = arith.addf %9, %146 : vector<1x256xf32>
    %cst_60 = arith.constant 1.500000e+01 : f32
    %148 = vector.broadcast %cst_60 : f32 to vector<1x256xf32>
    %149 = arith.cmpf ole, %147, %148 : vector<1x256xf32>
    %150 = arith.andi %145, %149 : vector<1x256xi1>
    %cst_61 = arith.constant 1.000000e+00 : f32
    %151 = vector.broadcast %cst_61 : f32 to vector<1x256xf32>
    %152 = arith.addf %17, %151 : vector<1x256xf32>
    %cst_62 = arith.constant 0.000000e+00 : f32
    %153 = vector.broadcast %cst_62 : f32 to vector<1x256xf32>
    %154 = arith.cmpf oge, %152, %153 : vector<1x256xf32>
    %cst_63 = arith.constant 1.000000e+00 : f32
    %155 = vector.broadcast %cst_63 : f32 to vector<1x256xf32>
    %156 = arith.addf %17, %155 : vector<1x256xf32>
    %cst_64 = arith.constant 1.500000e+01 : f32
    %157 = vector.broadcast %cst_64 : f32 to vector<1x256xf32>
    %158 = arith.cmpf ole, %156, %157 : vector<1x256xf32>
    %159 = arith.andi %154, %158 : vector<1x256xi1>
    %cst_65 = arith.constant 1.000000e+00 : f32
    %160 = vector.broadcast %cst_65 : f32 to vector<1x256xf32>
    %161 = arith.addf %9, %160 : vector<1x256xf32>
    %cst_66 = arith.constant 0.000000e+00 : f32
    %162 = vector.broadcast %cst_66 : f32 to vector<1x256xf32>
    %163 = arith.cmpf oge, %161, %162 : vector<1x256xf32>
    %164 = arith.andi %159, %163 : vector<1x256xi1>
    %cst_67 = arith.constant 1.000000e+00 : f32
    %165 = vector.broadcast %cst_67 : f32 to vector<1x256xf32>
    %166 = arith.addf %9, %165 : vector<1x256xf32>
    %cst_68 = arith.constant 1.500000e+01 : f32
    %167 = vector.broadcast %cst_68 : f32 to vector<1x256xf32>
    %168 = arith.cmpf ole, %166, %167 : vector<1x256xf32>
    %169 = arith.andi %164, %168 : vector<1x256xi1>
    %c0 = arith.constant 0 : index
    %c0_69 = arith.constant 0 : index
    %c0_70 = arith.constant 0 : index
    %170 = vector.load %arg1[%c0, %c0_69, %c0_70] : memref<1x4x256xf32, #tpu.memory_space<vmem>>, vector<1x4x256xf32>
    %171 = vector.shape_cast %170 : vector<1x4x256xf32> to vector<4x256xf32>
    %cst_71 = arith.constant 0.000000e+00 : f32
    %172 = vector.broadcast %cst_71 : f32 to vector<4x256xf32>
    %c17_i32 = arith.constant 17 : i32
    %173 = tpu.dynamic_rotate %171 by %c17_i32 dim 1 : vector<4x256xf32>, i32 -> vector<4x256xf32>
    %cst_72 = arith.constant 0.000000e+00 : f32
    %174 = vector.shape_cast %36 : vector<1x256xi1> to vector<1x256xi1>
    %175 = vector.broadcast %174 : vector<1x256xi1> to vector<4x256xi1>
    %176 = vector.broadcast %cst_72 : f32 to vector<4x256xf32>
    %177 = arith.select %175, %173, %176 : vector<4x256xi1>, vector<4x256xf32>
    %c0_73 = arith.constant 0 : index
    %c0_74 = arith.constant 0 : index
    %c0_75 = arith.constant 0 : index
    %178 = vector.load %arg2[%c0_73, %c0_74, %c0_75] : memref<9x4x4xbf16, #tpu.memory_space<vmem>>, vector<1x4x4xbf16>
    %179 = vector.shape_cast %178 : vector<1x4x4xbf16> to vector<4x4xbf16>
    %180 = arith.truncf %177 : vector<4x256xf32> to vector<4x256xbf16>
    %cst_76 = arith.constant dense<0.000000e+00> : vector<4x256xf32>
    %181 = tpu.matmul %179, %180, %cst_76 {dimension_numbers = #tpu.dot_dimension_numbers<[1], [0], [0], [1], [0, 0, 1, 1], [], []>} : vector<4x4xbf16>, vector<4x256xbf16>, vector<4x256xf32> -> vector<4x256xf32>
    %182 = arith.addf %172, %181 : vector<4x256xf32>
    %c16_i32 = arith.constant 16 : i32
    %183 = tpu.dynamic_rotate %171 by %c16_i32 dim 1 : vector<4x256xf32>, i32 -> vector<4x256xf32>
    %cst_77 = arith.constant 0.000000e+00 : f32
    %184 = vector.shape_cast %55 : vector<1x256xi1> to vector<1x256xi1>
    %185 = vector.broadcast %184 : vector<1x256xi1> to vector<4x256xi1>
    %186 = vector.broadcast %cst_77 : f32 to vector<4x256xf32>
    %187 = arith.select %185, %183, %186 : vector<4x256xi1>, vector<4x256xf32>
    %c1 = arith.constant 1 : index
    %c0_78 = arith.constant 0 : index
    %c0_79 = arith.constant 0 : index
    %188 = vector.load %arg2[%c1, %c0_78, %c0_79] : memref<9x4x4xbf16, #tpu.memory_space<vmem>>, vector<1x4x4xbf16>
    %189 = vector.shape_cast %188 : vector<1x4x4xbf16> to vector<4x4xbf16>
    %190 = arith.truncf %187 : vector<4x256xf32> to vector<4x256xbf16>
    %cst_80 = arith.constant dense<0.000000e+00> : vector<4x256xf32>
    %191 = tpu.matmul %189, %190, %cst_80 {dimension_numbers = #tpu.dot_dimension_numbers<[1], [0], [0], [1], [0, 0, 1, 1], [], []>} : vector<4x4xbf16>, vector<4x256xbf16>, vector<4x256xf32> -> vector<4x256xf32>
    %192 = arith.addf %182, %191 : vector<4x256xf32>
    %c15_i32 = arith.constant 15 : i32
    %193 = tpu.dynamic_rotate %171 by %c15_i32 dim 1 : vector<4x256xf32>, i32 -> vector<4x256xf32>
    %cst_81 = arith.constant 0.000000e+00 : f32
    %194 = vector.shape_cast %74 : vector<1x256xi1> to vector<1x256xi1>
    %195 = vector.broadcast %194 : vector<1x256xi1> to vector<4x256xi1>
    %196 = vector.broadcast %cst_81 : f32 to vector<4x256xf32>
    %197 = arith.select %195, %193, %196 : vector<4x256xi1>, vector<4x256xf32>
    %c2 = arith.constant 2 : index
    %c0_82 = arith.constant 0 : index
    %c0_83 = arith.constant 0 : index
    %198 = vector.load %arg2[%c2, %c0_82, %c0_83] : memref<9x4x4xbf16, #tpu.memory_space<vmem>>, vector<1x4x4xbf16>
    %199 = vector.shape_cast %198 : vector<1x4x4xbf16> to vector<4x4xbf16>
    %200 = arith.truncf %197 : vector<4x256xf32> to vector<4x256xbf16>
    %cst_84 = arith.constant dense<0.000000e+00> : vector<4x256xf32>
    %201 = tpu.matmul %199, %200, %cst_84 {dimension_numbers = #tpu.dot_dimension_numbers<[1], [0], [0], [1], [0, 0, 1, 1], [], []>} : vector<4x4xbf16>, vector<4x256xbf16>, vector<4x256xf32> -> vector<4x256xf32>
    %202 = arith.addf %192, %201 : vector<4x256xf32>
    %c1_i32 = arith.constant 1 : i32
    %203 = tpu.dynamic_rotate %171 by %c1_i32 dim 1 : vector<4x256xf32>, i32 -> vector<4x256xf32>
    %cst_85 = arith.constant 0.000000e+00 : f32
    %204 = vector.shape_cast %93 : vector<1x256xi1> to vector<1x256xi1>
    %205 = vector.broadcast %204 : vector<1x256xi1> to vector<4x256xi1>
    %206 = vector.broadcast %cst_85 : f32 to vector<4x256xf32>
    %207 = arith.select %205, %203, %206 : vector<4x256xi1>, vector<4x256xf32>
    %c3 = arith.constant 3 : index
    %c0_86 = arith.constant 0 : index
    %c0_87 = arith.constant 0 : index
    %208 = vector.load %arg2[%c3, %c0_86, %c0_87] : memref<9x4x4xbf16, #tpu.memory_space<vmem>>, vector<1x4x4xbf16>
    %209 = vector.shape_cast %208 : vector<1x4x4xbf16> to vector<4x4xbf16>
    %210 = arith.truncf %207 : vector<4x256xf32> to vector<4x256xbf16>
    %cst_88 = arith.constant dense<0.000000e+00> : vector<4x256xf32>
    %211 = tpu.matmul %209, %210, %cst_88 {dimension_numbers = #tpu.dot_dimension_numbers<[1], [0], [0], [1], [0, 0, 1, 1], [], []>} : vector<4x4xbf16>, vector<4x256xbf16>, vector<4x256xf32> -> vector<4x256xf32>
    %212 = arith.addf %202, %211 : vector<4x256xf32>
    %c4 = arith.constant 4 : index
    %c0_89 = arith.constant 0 : index
    %c0_90 = arith.constant 0 : index
    %213 = vector.load %arg2[%c4, %c0_89, %c0_90] : memref<9x4x4xbf16, #tpu.memory_space<vmem>>, vector<1x4x4xbf16>
    %214 = vector.shape_cast %213 : vector<1x4x4xbf16> to vector<4x4xbf16>
    %215 = arith.truncf %171 : vector<4x256xf32> to vector<4x256xbf16>
    %cst_91 = arith.constant dense<0.000000e+00> : vector<4x256xf32>
    %216 = tpu.matmul %214, %215, %cst_91 {dimension_numbers = #tpu.dot_dimension_numbers<[1], [0], [0], [1], [0, 0, 1, 1], [], []>} : vector<4x4xbf16>, vector<4x256xbf16>, vector<4x256xf32> -> vector<4x256xf32>
    %217 = arith.addf %212, %216 : vector<4x256xf32>
    %c255_i32 = arith.constant 255 : i32
    %218 = tpu.dynamic_rotate %171 by %c255_i32 dim 1 : vector<4x256xf32>, i32 -> vector<4x256xf32>
    %cst_92 = arith.constant 0.000000e+00 : f32
    %219 = vector.shape_cast %112 : vector<1x256xi1> to vector<1x256xi1>
    %220 = vector.broadcast %219 : vector<1x256xi1> to vector<4x256xi1>
    %221 = vector.broadcast %cst_92 : f32 to vector<4x256xf32>
    %222 = arith.select %220, %218, %221 : vector<4x256xi1>, vector<4x256xf32>
    %c5 = arith.constant 5 : index
    %c0_93 = arith.constant 0 : index
    %c0_94 = arith.constant 0 : index
    %223 = vector.load %arg2[%c5, %c0_93, %c0_94] : memref<9x4x4xbf16, #tpu.memory_space<vmem>>, vector<1x4x4xbf16>
    %224 = vector.shape_cast %223 : vector<1x4x4xbf16> to vector<4x4xbf16>
    %225 = arith.truncf %222 : vector<4x256xf32> to vector<4x256xbf16>
    %cst_95 = arith.constant dense<0.000000e+00> : vector<4x256xf32>
    %226 = tpu.matmul %224, %225, %cst_95 {dimension_numbers = #tpu.dot_dimension_numbers<[1], [0], [0], [1], [0, 0, 1, 1], [], []>} : vector<4x4xbf16>, vector<4x256xbf16>, vector<4x256xf32> -> vector<4x256xf32>
    %227 = arith.addf %217, %226 : vector<4x256xf32>
    %c241_i32 = arith.constant 241 : i32
    %228 = tpu.dynamic_rotate %171 by %c241_i32 dim 1 : vector<4x256xf32>, i32 -> vector<4x256xf32>
    %cst_96 = arith.constant 0.000000e+00 : f32
    %229 = vector.shape_cast %131 : vector<1x256xi1> to vector<1x256xi1>
    %230 = vector.broadcast %229 : vector<1x256xi1> to vector<4x256xi1>
    %231 = vector.broadcast %cst_96 : f32 to vector<4x256xf32>
    %232 = arith.select %230, %228, %231 : vector<4x256xi1>, vector<4x256xf32>
    %c6 = arith.constant 6 : index
    %c0_97 = arith.constant 0 : index
    %c0_98 = arith.constant 0 : index
    %233 = vector.load %arg2[%c6, %c0_97, %c0_98] : memref<9x4x4xbf16, #tpu.memory_space<vmem>>, vector<1x4x4xbf16>
    %234 = vector.shape_cast %233 : vector<1x4x4xbf16> to vector<4x4xbf16>
    %235 = arith.truncf %232 : vector<4x256xf32> to vector<4x256xbf16>
    %cst_99 = arith.constant dense<0.000000e+00> : vector<4x256xf32>
    %236 = tpu.matmul %234, %235, %cst_99 {dimension_numbers = #tpu.dot_dimension_numbers<[1], [0], [0], [1], [0, 0, 1, 1], [], []>} : vector<4x4xbf16>, vector<4x256xbf16>, vector<4x256xf32> -> vector<4x256xf32>
    %237 = arith.addf %227, %236 : vector<4x256xf32>
    %c240_i32 = arith.constant 240 : i32
    %238 = tpu.dynamic_rotate %171 by %c240_i32 dim 1 : vector<4x256xf32>, i32 -> vector<4x256xf32>
    %cst_100 = arith.constant 0.000000e+00 : f32
    %239 = vector.shape_cast %150 : vector<1x256xi1> to vector<1x256xi1>
    %240 = vector.broadcast %239 : vector<1x256xi1> to vector<4x256xi1>
    %241 = vector.broadcast %cst_100 : f32 to vector<4x256xf32>
    %242 = arith.select %240, %238, %241 : vector<4x256xi1>, vector<4x256xf32>
    %c7 = arith.constant 7 : index
    %c0_101 = arith.constant 0 : index
    %c0_102 = arith.constant 0 : index
    %243 = vector.load %arg2[%c7, %c0_101, %c0_102] : memref<9x4x4xbf16, #tpu.memory_space<vmem>>, vector<1x4x4xbf16>
    %244 = vector.shape_cast %243 : vector<1x4x4xbf16> to vector<4x4xbf16>
    %245 = arith.truncf %242 : vector<4x256xf32> to vector<4x256xbf16>
    %cst_103 = arith.constant dense<0.000000e+00> : vector<4x256xf32>
    %246 = tpu.matmul %244, %245, %cst_103 {dimension_numbers = #tpu.dot_dimension_numbers<[1], [0], [0], [1], [0, 0, 1, 1], [], []>} : vector<4x4xbf16>, vector<4x256xbf16>, vector<4x256xf32> -> vector<4x256xf32>
    %247 = arith.addf %237, %246 : vector<4x256xf32>
    %c239_i32 = arith.constant 239 : i32
    %248 = tpu.dynamic_rotate %171 by %c239_i32 dim 1 : vector<4x256xf32>, i32 -> vector<4x256xf32>
    %cst_104 = arith.constant 0.000000e+00 : f32
    %249 = vector.shape_cast %169 : vector<1x256xi1> to vector<1x256xi1>
    %250 = vector.broadcast %249 : vector<1x256xi1> to vector<4x256xi1>
    %251 = vector.broadcast %cst_104 : f32 to vector<4x256xf32>
    %252 = arith.select %250, %248, %251 : vector<4x256xi1>, vector<4x256xf32>
    %c8 = arith.constant 8 : index
    %c0_105 = arith.constant 0 : index
    %c0_106 = arith.constant 0 : index
    %253 = vector.load %arg2[%c8, %c0_105, %c0_106] : memref<9x4x4xbf16, #tpu.memory_space<vmem>>, vector<1x4x4xbf16>
    %254 = vector.shape_cast %253 : vector<1x4x4xbf16> to vector<4x4xbf16>
    %255 = arith.truncf %252 : vector<4x256xf32> to vector<4x256xbf16>
    %cst_107 = arith.constant dense<0.000000e+00> : vector<4x256xf32>
    %256 = tpu.matmul %254, %255, %cst_107 {dimension_numbers = #tpu.dot_dimension_numbers<[1], [0], [0], [1], [0, 0, 1, 1], [], []>} : vector<4x4xbf16>, vector<4x256xbf16>, vector<4x256xf32> -> vector<4x256xf32>
    %257 = arith.addf %247, %256 : vector<4x256xf32>
    %c0_108 = arith.constant 0 : index
    %c0_109 = arith.constant 0 : index
    %258 = vector.load %arg3[%c0_108, %c0_109] : memref<4x1xf32, #tpu.memory_space<vmem>>, vector<4x1xf32>
    %259 = vector.broadcast %258 : vector<4x1xf32> to vector<4x256xf32>
    %260 = arith.addf %257, %259 : vector<4x256xf32>
    %cst_110 = arith.constant 0.000000e+00 : f32
    %261 = vector.broadcast %cst_110 : f32 to vector<4x256xf32>
    %262 = arith.maximumf %260, %261 : vector<4x256xf32>
    %cst_111 = arith.constant 0.000000e+00 : f32
    %263 = vector.broadcast %cst_111 : f32 to vector<4x256xf32>
    %c17_i32_112 = arith.constant 17 : i32
    %264 = tpu.dynamic_rotate %262 by %c17_i32_112 dim 1 : vector<4x256xf32>, i32 -> vector<4x256xf32>
    %cst_113 = arith.constant 0.000000e+00 : f32
    %265 = vector.shape_cast %36 : vector<1x256xi1> to vector<1x256xi1>
    %266 = vector.broadcast %265 : vector<1x256xi1> to vector<4x256xi1>
    %267 = vector.broadcast %cst_113 : f32 to vector<4x256xf32>
    %268 = arith.select %266, %264, %267 : vector<4x256xi1>, vector<4x256xf32>
    %c0_114 = arith.constant 0 : index
    %c0_115 = arith.constant 0 : index
    %c0_116 = arith.constant 0 : index
    %269 = vector.load %arg4[%c0_114, %c0_115, %c0_116] : memref<9x4x4xbf16, #tpu.memory_space<vmem>>, vector<1x4x4xbf16>
    %270 = vector.shape_cast %269 : vector<1x4x4xbf16> to vector<4x4xbf16>
    %271 = arith.truncf %268 : vector<4x256xf32> to vector<4x256xbf16>
    %cst_117 = arith.constant dense<0.000000e+00> : vector<4x256xf32>
    %272 = tpu.matmul %270, %271, %cst_117 {dimension_numbers = #tpu.dot_dimension_numbers<[1], [0], [0], [1], [0, 0, 1, 1], [], []>} : vector<4x4xbf16>, vector<4x256xbf16>, vector<4x256xf32> -> vector<4x256xf32>
    %273 = arith.addf %263, %272 : vector<4x256xf32>
    %c16_i32_118 = arith.constant 16 : i32
    %274 = tpu.dynamic_rotate %262 by %c16_i32_118 dim 1 : vector<4x256xf32>, i32 -> vector<4x256xf32>
    %cst_119 = arith.constant 0.000000e+00 : f32
    %275 = vector.shape_cast %55 : vector<1x256xi1> to vector<1x256xi1>
    %276 = vector.broadcast %275 : vector<1x256xi1> to vector<4x256xi1>
    %277 = vector.broadcast %cst_119 : f32 to vector<4x256xf32>
    %278 = arith.select %276, %274, %277 : vector<4x256xi1>, vector<4x256xf32>
    %c1_120 = arith.constant 1 : index
    %c0_121 = arith.constant 0 : index
    %c0_122 = arith.constant 0 : index
    %279 = vector.load %arg4[%c1_120, %c0_121, %c0_122] : memref<9x4x4xbf16, #tpu.memory_space<vmem>>, vector<1x4x4xbf16>
    %280 = vector.shape_cast %279 : vector<1x4x4xbf16> to vector<4x4xbf16>
    %281 = arith.truncf %278 : vector<4x256xf32> to vector<4x256xbf16>
    %cst_123 = arith.constant dense<0.000000e+00> : vector<4x256xf32>
    %282 = tpu.matmul %280, %281, %cst_123 {dimension_numbers = #tpu.dot_dimension_numbers<[1], [0], [0], [1], [0, 0, 1, 1], [], []>} : vector<4x4xbf16>, vector<4x256xbf16>, vector<4x256xf32> -> vector<4x256xf32>
    %283 = arith.addf %273, %282 : vector<4x256xf32>
    %c15_i32_124 = arith.constant 15 : i32
    %284 = tpu.dynamic_rotate %262 by %c15_i32_124 dim 1 : vector<4x256xf32>, i32 -> vector<4x256xf32>
    %cst_125 = arith.constant 0.000000e+00 : f32
    %285 = vector.shape_cast %74 : vector<1x256xi1> to vector<1x256xi1>
    %286 = vector.broadcast %285 : vector<1x256xi1> to vector<4x256xi1>
    %287 = vector.broadcast %cst_125 : f32 to vector<4x256xf32>
    %288 = arith.select %286, %284, %287 : vector<4x256xi1>, vector<4x256xf32>
    %c2_126 = arith.constant 2 : index
    %c0_127 = arith.constant 0 : index
    %c0_128 = arith.constant 0 : index
    %289 = vector.load %arg4[%c2_126, %c0_127, %c0_128] : memref<9x4x4xbf16, #tpu.memory_space<vmem>>, vector<1x4x4xbf16>
    %290 = vector.shape_cast %289 : vector<1x4x4xbf16> to vector<4x4xbf16>
    %291 = arith.truncf %288 : vector<4x256xf32> to vector<4x256xbf16>
    %cst_129 = arith.constant dense<0.000000e+00> : vector<4x256xf32>
    %292 = tpu.matmul %290, %291, %cst_129 {dimension_numbers = #tpu.dot_dimension_numbers<[1], [0], [0], [1], [0, 0, 1, 1], [], []>} : vector<4x4xbf16>, vector<4x256xbf16>, vector<4x256xf32> -> vector<4x256xf32>
    %293 = arith.addf %283, %292 : vector<4x256xf32>
    %c1_i32_130 = arith.constant 1 : i32
    %294 = tpu.dynamic_rotate %262 by %c1_i32_130 dim 1 : vector<4x256xf32>, i32 -> vector<4x256xf32>
    %cst_131 = arith.constant 0.000000e+00 : f32
    %295 = vector.shape_cast %93 : vector<1x256xi1> to vector<1x256xi1>
    %296 = vector.broadcast %295 : vector<1x256xi1> to vector<4x256xi1>
    %297 = vector.broadcast %cst_131 : f32 to vector<4x256xf32>
    %298 = arith.select %296, %294, %297 : vector<4x256xi1>, vector<4x256xf32>
    %c3_132 = arith.constant 3 : index
    %c0_133 = arith.constant 0 : index
    %c0_134 = arith.constant 0 : index
    %299 = vector.load %arg4[%c3_132, %c0_133, %c0_134] : memref<9x4x4xbf16, #tpu.memory_space<vmem>>, vector<1x4x4xbf16>
    %300 = vector.shape_cast %299 : vector<1x4x4xbf16> to vector<4x4xbf16>
    %301 = arith.truncf %298 : vector<4x256xf32> to vector<4x256xbf16>
    %cst_135 = arith.constant dense<0.000000e+00> : vector<4x256xf32>
    %302 = tpu.matmul %300, %301, %cst_135 {dimension_numbers = #tpu.dot_dimension_numbers<[1], [0], [0], [1], [0, 0, 1, 1], [], []>} : vector<4x4xbf16>, vector<4x256xbf16>, vector<4x256xf32> -> vector<4x256xf32>
    %303 = arith.addf %293, %302 : vector<4x256xf32>
    %c4_136 = arith.constant 4 : index
    %c0_137 = arith.constant 0 : index
    %c0_138 = arith.constant 0 : index
    %304 = vector.load %arg4[%c4_136, %c0_137, %c0_138] : memref<9x4x4xbf16, #tpu.memory_space<vmem>>, vector<1x4x4xbf16>
    %305 = vector.shape_cast %304 : vector<1x4x4xbf16> to vector<4x4xbf16>
    %306 = arith.truncf %262 : vector<4x256xf32> to vector<4x256xbf16>
    %cst_139 = arith.constant dense<0.000000e+00> : vector<4x256xf32>
    %307 = tpu.matmul %305, %306, %cst_139 {dimension_numbers = #tpu.dot_dimension_numbers<[1], [0], [0], [1], [0, 0, 1, 1], [], []>} : vector<4x4xbf16>, vector<4x256xbf16>, vector<4x256xf32> -> vector<4x256xf32>
    %308 = arith.addf %303, %307 : vector<4x256xf32>
    %c255_i32_140 = arith.constant 255 : i32
    %309 = tpu.dynamic_rotate %262 by %c255_i32_140 dim 1 : vector<4x256xf32>, i32 -> vector<4x256xf32>
    %cst_141 = arith.constant 0.000000e+00 : f32
    %310 = vector.shape_cast %112 : vector<1x256xi1> to vector<1x256xi1>
    %311 = vector.broadcast %310 : vector<1x256xi1> to vector<4x256xi1>
    %312 = vector.broadcast %cst_141 : f32 to vector<4x256xf32>
    %313 = arith.select %311, %309, %312 : vector<4x256xi1>, vector<4x256xf32>
    %c5_142 = arith.constant 5 : index
    %c0_143 = arith.constant 0 : index
    %c0_144 = arith.constant 0 : index
    %314 = vector.load %arg4[%c5_142, %c0_143, %c0_144] : memref<9x4x4xbf16, #tpu.memory_space<vmem>>, vector<1x4x4xbf16>
    %315 = vector.shape_cast %314 : vector<1x4x4xbf16> to vector<4x4xbf16>
    %316 = arith.truncf %313 : vector<4x256xf32> to vector<4x256xbf16>
    %cst_145 = arith.constant dense<0.000000e+00> : vector<4x256xf32>
    %317 = tpu.matmul %315, %316, %cst_145 {dimension_numbers = #tpu.dot_dimension_numbers<[1], [0], [0], [1], [0, 0, 1, 1], [], []>} : vector<4x4xbf16>, vector<4x256xbf16>, vector<4x256xf32> -> vector<4x256xf32>
    %318 = arith.addf %308, %317 : vector<4x256xf32>
    %c241_i32_146 = arith.constant 241 : i32
    %319 = tpu.dynamic_rotate %262 by %c241_i32_146 dim 1 : vector<4x256xf32>, i32 -> vector<4x256xf32>
    %cst_147 = arith.constant 0.000000e+00 : f32
    %320 = vector.shape_cast %131 : vector<1x256xi1> to vector<1x256xi1>
    %321 = vector.broadcast %320 : vector<1x256xi1> to vector<4x256xi1>
    %322 = vector.broadcast %cst_147 : f32 to vector<4x256xf32>
    %323 = arith.select %321, %319, %322 : vector<4x256xi1>, vector<4x256xf32>
    %c6_148 = arith.constant 6 : index
    %c0_149 = arith.constant 0 : index
    %c0_150 = arith.constant 0 : index
    %324 = vector.load %arg4[%c6_148, %c0_149, %c0_150] : memref<9x4x4xbf16, #tpu.memory_space<vmem>>, vector<1x4x4xbf16>
    %325 = vector.shape_cast %324 : vector<1x4x4xbf16> to vector<4x4xbf16>
    %326 = arith.truncf %323 : vector<4x256xf32> to vector<4x256xbf16>
    %cst_151 = arith.constant dense<0.000000e+00> : vector<4x256xf32>
    %327 = tpu.matmul %325, %326, %cst_151 {dimension_numbers = #tpu.dot_dimension_numbers<[1], [0], [0], [1], [0, 0, 1, 1], [], []>} : vector<4x4xbf16>, vector<4x256xbf16>, vector<4x256xf32> -> vector<4x256xf32>
    %328 = arith.addf %318, %327 : vector<4x256xf32>
    %c240_i32_152 = arith.constant 240 : i32
    %329 = tpu.dynamic_rotate %262 by %c240_i32_152 dim 1 : vector<4x256xf32>, i32 -> vector<4x256xf32>
    %cst_153 = arith.constant 0.000000e+00 : f32
    %330 = vector.shape_cast %150 : vector<1x256xi1> to vector<1x256xi1>
    %331 = vector.broadcast %330 : vector<1x256xi1> to vector<4x256xi1>
    %332 = vector.broadcast %cst_153 : f32 to vector<4x256xf32>
    %333 = arith.select %331, %329, %332 : vector<4x256xi1>, vector<4x256xf32>
    %c7_154 = arith.constant 7 : index
    %c0_155 = arith.constant 0 : index
    %c0_156 = arith.constant 0 : index
    %334 = vector.load %arg4[%c7_154, %c0_155, %c0_156] : memref<9x4x4xbf16, #tpu.memory_space<vmem>>, vector<1x4x4xbf16>
    %335 = vector.shape_cast %334 : vector<1x4x4xbf16> to vector<4x4xbf16>
    %336 = arith.truncf %333 : vector<4x256xf32> to vector<4x256xbf16>
    %cst_157 = arith.constant dense<0.000000e+00> : vector<4x256xf32>
    %337 = tpu.matmul %335, %336, %cst_157 {dimension_numbers = #tpu.dot_dimension_numbers<[1], [0], [0], [1], [0, 0, 1, 1], [], []>} : vector<4x4xbf16>, vector<4x256xbf16>, vector<4x256xf32> -> vector<4x256xf32>
    %338 = arith.addf %328, %337 : vector<4x256xf32>
    %c239_i32_158 = arith.constant 239 : i32
    %339 = tpu.dynamic_rotate %262 by %c239_i32_158 dim 1 : vector<4x256xf32>, i32 -> vector<4x256xf32>
    %cst_159 = arith.constant 0.000000e+00 : f32
    %340 = vector.shape_cast %169 : vector<1x256xi1> to vector<1x256xi1>
    %341 = vector.broadcast %340 : vector<1x256xi1> to vector<4x256xi1>
    %342 = vector.broadcast %cst_159 : f32 to vector<4x256xf32>
    %343 = arith.select %341, %339, %342 : vector<4x256xi1>, vector<4x256xf32>
    %c8_160 = arith.constant 8 : index
    %c0_161 = arith.constant 0 : index
    %c0_162 = arith.constant 0 : index
    %344 = vector.load %arg4[%c8_160, %c0_161, %c0_162] : memref<9x4x4xbf16, #tpu.memory_space<vmem>>, vector<1x4x4xbf16>
    %345 = vector.shape_cast %344 : vector<1x4x4xbf16> to vector<4x4xbf16>
    %346 = arith.truncf %343 : vector<4x256xf32> to vector<4x256xbf16>
    %cst_163 = arith.constant dense<0.000000e+00> : vector<4x256xf32>
    %347 = tpu.matmul %345, %346, %cst_163 {dimension_numbers = #tpu.dot_dimension_numbers<[1], [0], [0], [1], [0, 0, 1, 1], [], []>} : vector<4x4xbf16>, vector<4x256xbf16>, vector<4x256xf32> -> vector<4x256xf32>
    %348 = arith.addf %338, %347 : vector<4x256xf32>
    %c0_164 = arith.constant 0 : index
    %c0_165 = arith.constant 0 : index
    %349 = vector.load %arg5[%c0_164, %c0_165] : memref<4x1xf32, #tpu.memory_space<vmem>>, vector<4x1xf32>
    %350 = vector.broadcast %349 : vector<4x1xf32> to vector<4x256xf32>
    %351 = arith.addf %348, %350 : vector<4x256xf32>
    %cst_166 = arith.constant 0.000000e+00 : f32
    %352 = vector.broadcast %cst_166 : f32 to vector<4x256xf32>
    %353 = arith.maximumf %351, %352 : vector<4x256xf32>
    %cst_167 = arith.constant 0.000000e+00 : f32
    %354 = vector.broadcast %cst_167 : f32 to vector<4x256xf32>
    %c17_i32_168 = arith.constant 17 : i32
    %355 = tpu.dynamic_rotate %353 by %c17_i32_168 dim 1 : vector<4x256xf32>, i32 -> vector<4x256xf32>
    %cst_169 = arith.constant 0.000000e+00 : f32
    %356 = vector.shape_cast %36 : vector<1x256xi1> to vector<1x256xi1>
    %357 = vector.broadcast %356 : vector<1x256xi1> to vector<4x256xi1>
    %358 = vector.broadcast %cst_169 : f32 to vector<4x256xf32>
    %359 = arith.select %357, %355, %358 : vector<4x256xi1>, vector<4x256xf32>
    %c0_170 = arith.constant 0 : index
    %c0_171 = arith.constant 0 : index
    %c0_172 = arith.constant 0 : index
    %360 = vector.load %arg6[%c0_170, %c0_171, %c0_172] : memref<9x4x4xbf16, #tpu.memory_space<vmem>>, vector<1x4x4xbf16>
    %361 = vector.shape_cast %360 : vector<1x4x4xbf16> to vector<4x4xbf16>
    %362 = arith.truncf %359 : vector<4x256xf32> to vector<4x256xbf16>
    %cst_173 = arith.constant dense<0.000000e+00> : vector<4x256xf32>
    %363 = tpu.matmul %361, %362, %cst_173 {dimension_numbers = #tpu.dot_dimension_numbers<[1], [0], [0], [1], [0, 0, 1, 1], [], []>} : vector<4x4xbf16>, vector<4x256xbf16>, vector<4x256xf32> -> vector<4x256xf32>
    %364 = arith.addf %354, %363 : vector<4x256xf32>
    %c16_i32_174 = arith.constant 16 : i32
    %365 = tpu.dynamic_rotate %353 by %c16_i32_174 dim 1 : vector<4x256xf32>, i32 -> vector<4x256xf32>
    %cst_175 = arith.constant 0.000000e+00 : f32
    %366 = vector.shape_cast %55 : vector<1x256xi1> to vector<1x256xi1>
    %367 = vector.broadcast %366 : vector<1x256xi1> to vector<4x256xi1>
    %368 = vector.broadcast %cst_175 : f32 to vector<4x256xf32>
    %369 = arith.select %367, %365, %368 : vector<4x256xi1>, vector<4x256xf32>
    %c1_176 = arith.constant 1 : index
    %c0_177 = arith.constant 0 : index
    %c0_178 = arith.constant 0 : index
    %370 = vector.load %arg6[%c1_176, %c0_177, %c0_178] : memref<9x4x4xbf16, #tpu.memory_space<vmem>>, vector<1x4x4xbf16>
    %371 = vector.shape_cast %370 : vector<1x4x4xbf16> to vector<4x4xbf16>
    %372 = arith.truncf %369 : vector<4x256xf32> to vector<4x256xbf16>
    %cst_179 = arith.constant dense<0.000000e+00> : vector<4x256xf32>
    %373 = tpu.matmul %371, %372, %cst_179 {dimension_numbers = #tpu.dot_dimension_numbers<[1], [0], [0], [1], [0, 0, 1, 1], [], []>} : vector<4x4xbf16>, vector<4x256xbf16>, vector<4x256xf32> -> vector<4x256xf32>
    %374 = arith.addf %364, %373 : vector<4x256xf32>
    %c15_i32_180 = arith.constant 15 : i32
    %375 = tpu.dynamic_rotate %353 by %c15_i32_180 dim 1 : vector<4x256xf32>, i32 -> vector<4x256xf32>
    %cst_181 = arith.constant 0.000000e+00 : f32
    %376 = vector.shape_cast %74 : vector<1x256xi1> to vector<1x256xi1>
    %377 = vector.broadcast %376 : vector<1x256xi1> to vector<4x256xi1>
    %378 = vector.broadcast %cst_181 : f32 to vector<4x256xf32>
    %379 = arith.select %377, %375, %378 : vector<4x256xi1>, vector<4x256xf32>
    %c2_182 = arith.constant 2 : index
    %c0_183 = arith.constant 0 : index
    %c0_184 = arith.constant 0 : index
    %380 = vector.load %arg6[%c2_182, %c0_183, %c0_184] : memref<9x4x4xbf16, #tpu.memory_space<vmem>>, vector<1x4x4xbf16>
    %381 = vector.shape_cast %380 : vector<1x4x4xbf16> to vector<4x4xbf16>
    %382 = arith.truncf %379 : vector<4x256xf32> to vector<4x256xbf16>
    %cst_185 = arith.constant dense<0.000000e+00> : vector<4x256xf32>
    %383 = tpu.matmul %381, %382, %cst_185 {dimension_numbers = #tpu.dot_dimension_numbers<[1], [0], [0], [1], [0, 0, 1, 1], [], []>} : vector<4x4xbf16>, vector<4x256xbf16>, vector<4x256xf32> -> vector<4x256xf32>
    %384 = arith.addf %374, %383 : vector<4x256xf32>
    %c1_i32_186 = arith.constant 1 : i32
    %385 = tpu.dynamic_rotate %353 by %c1_i32_186 dim 1 : vector<4x256xf32>, i32 -> vector<4x256xf32>
    %cst_187 = arith.constant 0.000000e+00 : f32
    %386 = vector.shape_cast %93 : vector<1x256xi1> to vector<1x256xi1>
    %387 = vector.broadcast %386 : vector<1x256xi1> to vector<4x256xi1>
    %388 = vector.broadcast %cst_187 : f32 to vector<4x256xf32>
    %389 = arith.select %387, %385, %388 : vector<4x256xi1>, vector<4x256xf32>
    %c3_188 = arith.constant 3 : index
    %c0_189 = arith.constant 0 : index
    %c0_190 = arith.constant 0 : index
    %390 = vector.load %arg6[%c3_188, %c0_189, %c0_190] : memref<9x4x4xbf16, #tpu.memory_space<vmem>>, vector<1x4x4xbf16>
    %391 = vector.shape_cast %390 : vector<1x4x4xbf16> to vector<4x4xbf16>
    %392 = arith.truncf %389 : vector<4x256xf32> to vector<4x256xbf16>
    %cst_191 = arith.constant dense<0.000000e+00> : vector<4x256xf32>
    %393 = tpu.matmul %391, %392, %cst_191 {dimension_numbers = #tpu.dot_dimension_numbers<[1], [0], [0], [1], [0, 0, 1, 1], [], []>} : vector<4x4xbf16>, vector<4x256xbf16>, vector<4x256xf32> -> vector<4x256xf32>
    %394 = arith.addf %384, %393 : vector<4x256xf32>
    %c4_192 = arith.constant 4 : index
    %c0_193 = arith.constant 0 : index
    %c0_194 = arith.constant 0 : index
    %395 = vector.load %arg6[%c4_192, %c0_193, %c0_194] : memref<9x4x4xbf16, #tpu.memory_space<vmem>>, vector<1x4x4xbf16>
    %396 = vector.shape_cast %395 : vector<1x4x4xbf16> to vector<4x4xbf16>
    %397 = arith.truncf %353 : vector<4x256xf32> to vector<4x256xbf16>
    %cst_195 = arith.constant dense<0.000000e+00> : vector<4x256xf32>
    %398 = tpu.matmul %396, %397, %cst_195 {dimension_numbers = #tpu.dot_dimension_numbers<[1], [0], [0], [1], [0, 0, 1, 1], [], []>} : vector<4x4xbf16>, vector<4x256xbf16>, vector<4x256xf32> -> vector<4x256xf32>
    %399 = arith.addf %394, %398 : vector<4x256xf32>
    %c255_i32_196 = arith.constant 255 : i32
    %400 = tpu.dynamic_rotate %353 by %c255_i32_196 dim 1 : vector<4x256xf32>, i32 -> vector<4x256xf32>
    %cst_197 = arith.constant 0.000000e+00 : f32
    %401 = vector.shape_cast %112 : vector<1x256xi1> to vector<1x256xi1>
    %402 = vector.broadcast %401 : vector<1x256xi1> to vector<4x256xi1>
    %403 = vector.broadcast %cst_197 : f32 to vector<4x256xf32>
    %404 = arith.select %402, %400, %403 : vector<4x256xi1>, vector<4x256xf32>
    %c5_198 = arith.constant 5 : index
    %c0_199 = arith.constant 0 : index
    %c0_200 = arith.constant 0 : index
    %405 = vector.load %arg6[%c5_198, %c0_199, %c0_200] : memref<9x4x4xbf16, #tpu.memory_space<vmem>>, vector<1x4x4xbf16>
    %406 = vector.shape_cast %405 : vector<1x4x4xbf16> to vector<4x4xbf16>
    %407 = arith.truncf %404 : vector<4x256xf32> to vector<4x256xbf16>
    %cst_201 = arith.constant dense<0.000000e+00> : vector<4x256xf32>
    %408 = tpu.matmul %406, %407, %cst_201 {dimension_numbers = #tpu.dot_dimension_numbers<[1], [0], [0], [1], [0, 0, 1, 1], [], []>} : vector<4x4xbf16>, vector<4x256xbf16>, vector<4x256xf32> -> vector<4x256xf32>
    %409 = arith.addf %399, %408 : vector<4x256xf32>
    %c241_i32_202 = arith.constant 241 : i32
    %410 = tpu.dynamic_rotate %353 by %c241_i32_202 dim 1 : vector<4x256xf32>, i32 -> vector<4x256xf32>
    %cst_203 = arith.constant 0.000000e+00 : f32
    %411 = vector.shape_cast %131 : vector<1x256xi1> to vector<1x256xi1>
    %412 = vector.broadcast %411 : vector<1x256xi1> to vector<4x256xi1>
    %413 = vector.broadcast %cst_203 : f32 to vector<4x256xf32>
    %414 = arith.select %412, %410, %413 : vector<4x256xi1>, vector<4x256xf32>
    %c6_204 = arith.constant 6 : index
    %c0_205 = arith.constant 0 : index
    %c0_206 = arith.constant 0 : index
    %415 = vector.load %arg6[%c6_204, %c0_205, %c0_206] : memref<9x4x4xbf16, #tpu.memory_space<vmem>>, vector<1x4x4xbf16>
    %416 = vector.shape_cast %415 : vector<1x4x4xbf16> to vector<4x4xbf16>
    %417 = arith.truncf %414 : vector<4x256xf32> to vector<4x256xbf16>
    %cst_207 = arith.constant dense<0.000000e+00> : vector<4x256xf32>
    %418 = tpu.matmul %416, %417, %cst_207 {dimension_numbers = #tpu.dot_dimension_numbers<[1], [0], [0], [1], [0, 0, 1, 1], [], []>} : vector<4x4xbf16>, vector<4x256xbf16>, vector<4x256xf32> -> vector<4x256xf32>
    %419 = arith.addf %409, %418 : vector<4x256xf32>
    %c240_i32_208 = arith.constant 240 : i32
    %420 = tpu.dynamic_rotate %353 by %c240_i32_208 dim 1 : vector<4x256xf32>, i32 -> vector<4x256xf32>
    %cst_209 = arith.constant 0.000000e+00 : f32
    %421 = vector.shape_cast %150 : vector<1x256xi1> to vector<1x256xi1>
    %422 = vector.broadcast %421 : vector<1x256xi1> to vector<4x256xi1>
    %423 = vector.broadcast %cst_209 : f32 to vector<4x256xf32>
    %424 = arith.select %422, %420, %423 : vector<4x256xi1>, vector<4x256xf32>
    %c7_210 = arith.constant 7 : index
    %c0_211 = arith.constant 0 : index
    %c0_212 = arith.constant 0 : index
    %425 = vector.load %arg6[%c7_210, %c0_211, %c0_212] : memref<9x4x4xbf16, #tpu.memory_space<vmem>>, vector<1x4x4xbf16>
    %426 = vector.shape_cast %425 : vector<1x4x4xbf16> to vector<4x4xbf16>
    %427 = arith.truncf %424 : vector<4x256xf32> to vector<4x256xbf16>
    %cst_213 = arith.constant dense<0.000000e+00> : vector<4x256xf32>
    %428 = tpu.matmul %426, %427, %cst_213 {dimension_numbers = #tpu.dot_dimension_numbers<[1], [0], [0], [1], [0, 0, 1, 1], [], []>} : vector<4x4xbf16>, vector<4x256xbf16>, vector<4x256xf32> -> vector<4x256xf32>
    %429 = arith.addf %419, %428 : vector<4x256xf32>
    %c239_i32_214 = arith.constant 239 : i32
    %430 = tpu.dynamic_rotate %353 by %c239_i32_214 dim 1 : vector<4x256xf32>, i32 -> vector<4x256xf32>
    %cst_215 = arith.constant 0.000000e+00 : f32
    %431 = vector.shape_cast %169 : vector<1x256xi1> to vector<1x256xi1>
    %432 = vector.broadcast %431 : vector<1x256xi1> to vector<4x256xi1>
    %433 = vector.broadcast %cst_215 : f32 to vector<4x256xf32>
    %434 = arith.select %432, %430, %433 : vector<4x256xi1>, vector<4x256xf32>
    %c8_216 = arith.constant 8 : index
    %c0_217 = arith.constant 0 : index
    %c0_218 = arith.constant 0 : index
    %435 = vector.load %arg6[%c8_216, %c0_217, %c0_218] : memref<9x4x4xbf16, #tpu.memory_space<vmem>>, vector<1x4x4xbf16>
    %436 = vector.shape_cast %435 : vector<1x4x4xbf16> to vector<4x4xbf16>
    %437 = arith.truncf %434 : vector<4x256xf32> to vector<4x256xbf16>
    %cst_219 = arith.constant dense<0.000000e+00> : vector<4x256xf32>
    %438 = tpu.matmul %436, %437, %cst_219 {dimension_numbers = #tpu.dot_dimension_numbers<[1], [0], [0], [1], [0, 0, 1, 1], [], []>} : vector<4x4xbf16>, vector<4x256xbf16>, vector<4x256xf32> -> vector<4x256xf32>
    %439 = arith.addf %429, %438 : vector<4x256xf32>
    %c0_220 = arith.constant 0 : index
    %c0_221 = arith.constant 0 : index
    %440 = vector.load %arg7[%c0_220, %c0_221] : memref<4x1xf32, #tpu.memory_space<vmem>>, vector<4x1xf32>
    %441 = vector.broadcast %440 : vector<4x1xf32> to vector<4x256xf32>
    %442 = arith.addf %439, %441 : vector<4x256xf32>
    %cst_222 = arith.constant 0.000000e+00 : f32
    %443 = vector.broadcast %cst_222 : f32 to vector<4x256xf32>
    %444 = arith.maximumf %442, %443 : vector<4x256xf32>
    %cst_223 = arith.constant 0.000000e+00 : f32
    %445 = vector.broadcast %cst_223 : f32 to vector<4x256xf32>
    %c17_i32_224 = arith.constant 17 : i32
    %446 = tpu.dynamic_rotate %444 by %c17_i32_224 dim 1 : vector<4x256xf32>, i32 -> vector<4x256xf32>
    %cst_225 = arith.constant 0.000000e+00 : f32
    %447 = vector.shape_cast %36 : vector<1x256xi1> to vector<1x256xi1>
    %448 = vector.broadcast %447 : vector<1x256xi1> to vector<4x256xi1>
    %449 = vector.broadcast %cst_225 : f32 to vector<4x256xf32>
    %450 = arith.select %448, %446, %449 : vector<4x256xi1>, vector<4x256xf32>
    %c0_226 = arith.constant 0 : index
    %c0_227 = arith.constant 0 : index
    %c0_228 = arith.constant 0 : index
    %451 = vector.load %arg8[%c0_226, %c0_227, %c0_228] : memref<9x4x4xbf16, #tpu.memory_space<vmem>>, vector<1x4x4xbf16>
    %452 = vector.shape_cast %451 : vector<1x4x4xbf16> to vector<4x4xbf16>
    %453 = arith.truncf %450 : vector<4x256xf32> to vector<4x256xbf16>
    %cst_229 = arith.constant dense<0.000000e+00> : vector<4x256xf32>
    %454 = tpu.matmul %452, %453, %cst_229 {dimension_numbers = #tpu.dot_dimension_numbers<[1], [0], [0], [1], [0, 0, 1, 1], [], []>} : vector<4x4xbf16>, vector<4x256xbf16>, vector<4x256xf32> -> vector<4x256xf32>
    %455 = arith.addf %445, %454 : vector<4x256xf32>
    %c16_i32_230 = arith.constant 16 : i32
    %456 = tpu.dynamic_rotate %444 by %c16_i32_230 dim 1 : vector<4x256xf32>, i32 -> vector<4x256xf32>
    %cst_231 = arith.constant 0.000000e+00 : f32
    %457 = vector.shape_cast %55 : vector<1x256xi1> to vector<1x256xi1>
    %458 = vector.broadcast %457 : vector<1x256xi1> to vector<4x256xi1>
    %459 = vector.broadcast %cst_231 : f32 to vector<4x256xf32>
    %460 = arith.select %458, %456, %459 : vector<4x256xi1>, vector<4x256xf32>
    %c1_232 = arith.constant 1 : index
    %c0_233 = arith.constant 0 : index
    %c0_234 = arith.constant 0 : index
    %461 = vector.load %arg8[%c1_232, %c0_233, %c0_234] : memref<9x4x4xbf16, #tpu.memory_space<vmem>>, vector<1x4x4xbf16>
    %462 = vector.shape_cast %461 : vector<1x4x4xbf16> to vector<4x4xbf16>
    %463 = arith.truncf %460 : vector<4x256xf32> to vector<4x256xbf16>
    %cst_235 = arith.constant dense<0.000000e+00> : vector<4x256xf32>
    %464 = tpu.matmul %462, %463, %cst_235 {dimension_numbers = #tpu.dot_dimension_numbers<[1], [0], [0], [1], [0, 0, 1, 1], [], []>} : vector<4x4xbf16>, vector<4x256xbf16>, vector<4x256xf32> -> vector<4x256xf32>
    %465 = arith.addf %455, %464 : vector<4x256xf32>
    %c15_i32_236 = arith.constant 15 : i32
    %466 = tpu.dynamic_rotate %444 by %c15_i32_236 dim 1 : vector<4x256xf32>, i32 -> vector<4x256xf32>
    %cst_237 = arith.constant 0.000000e+00 : f32
    %467 = vector.shape_cast %74 : vector<1x256xi1> to vector<1x256xi1>
    %468 = vector.broadcast %467 : vector<1x256xi1> to vector<4x256xi1>
    %469 = vector.broadcast %cst_237 : f32 to vector<4x256xf32>
    %470 = arith.select %468, %466, %469 : vector<4x256xi1>, vector<4x256xf32>
    %c2_238 = arith.constant 2 : index
    %c0_239 = arith.constant 0 : index
    %c0_240 = arith.constant 0 : index
    %471 = vector.load %arg8[%c2_238, %c0_239, %c0_240] : memref<9x4x4xbf16, #tpu.memory_space<vmem>>, vector<1x4x4xbf16>
    %472 = vector.shape_cast %471 : vector<1x4x4xbf16> to vector<4x4xbf16>
    %473 = arith.truncf %470 : vector<4x256xf32> to vector<4x256xbf16>
    %cst_241 = arith.constant dense<0.000000e+00> : vector<4x256xf32>
    %474 = tpu.matmul %472, %473, %cst_241 {dimension_numbers = #tpu.dot_dimension_numbers<[1], [0], [0], [1], [0, 0, 1, 1], [], []>} : vector<4x4xbf16>, vector<4x256xbf16>, vector<4x256xf32> -> vector<4x256xf32>
    %475 = arith.addf %465, %474 : vector<4x256xf32>
    %c1_i32_242 = arith.constant 1 : i32
    %476 = tpu.dynamic_rotate %444 by %c1_i32_242 dim 1 : vector<4x256xf32>, i32 -> vector<4x256xf32>
    %cst_243 = arith.constant 0.000000e+00 : f32
    %477 = vector.shape_cast %93 : vector<1x256xi1> to vector<1x256xi1>
    %478 = vector.broadcast %477 : vector<1x256xi1> to vector<4x256xi1>
    %479 = vector.broadcast %cst_243 : f32 to vector<4x256xf32>
    %480 = arith.select %478, %476, %479 : vector<4x256xi1>, vector<4x256xf32>
    %c3_244 = arith.constant 3 : index
    %c0_245 = arith.constant 0 : index
    %c0_246 = arith.constant 0 : index
    %481 = vector.load %arg8[%c3_244, %c0_245, %c0_246] : memref<9x4x4xbf16, #tpu.memory_space<vmem>>, vector<1x4x4xbf16>
    %482 = vector.shape_cast %481 : vector<1x4x4xbf16> to vector<4x4xbf16>
    %483 = arith.truncf %480 : vector<4x256xf32> to vector<4x256xbf16>
    %cst_247 = arith.constant dense<0.000000e+00> : vector<4x256xf32>
    %484 = tpu.matmul %482, %483, %cst_247 {dimension_numbers = #tpu.dot_dimension_numbers<[1], [0], [0], [1], [0, 0, 1, 1], [], []>} : vector<4x4xbf16>, vector<4x256xbf16>, vector<4x256xf32> -> vector<4x256xf32>
    %485 = arith.addf %475, %484 : vector<4x256xf32>
    %c4_248 = arith.constant 4 : index
    %c0_249 = arith.constant 0 : index
    %c0_250 = arith.constant 0 : index
    %486 = vector.load %arg8[%c4_248, %c0_249, %c0_250] : memref<9x4x4xbf16, #tpu.memory_space<vmem>>, vector<1x4x4xbf16>
    %487 = vector.shape_cast %486 : vector<1x4x4xbf16> to vector<4x4xbf16>
    %488 = arith.truncf %444 : vector<4x256xf32> to vector<4x256xbf16>
    %cst_251 = arith.constant dense<0.000000e+00> : vector<4x256xf32>
    %489 = tpu.matmul %487, %488, %cst_251 {dimension_numbers = #tpu.dot_dimension_numbers<[1], [0], [0], [1], [0, 0, 1, 1], [], []>} : vector<4x4xbf16>, vector<4x256xbf16>, vector<4x256xf32> -> vector<4x256xf32>
    %490 = arith.addf %485, %489 : vector<4x256xf32>
    %c255_i32_252 = arith.constant 255 : i32
    %491 = tpu.dynamic_rotate %444 by %c255_i32_252 dim 1 : vector<4x256xf32>, i32 -> vector<4x256xf32>
    %cst_253 = arith.constant 0.000000e+00 : f32
    %492 = vector.shape_cast %112 : vector<1x256xi1> to vector<1x256xi1>
    %493 = vector.broadcast %492 : vector<1x256xi1> to vector<4x256xi1>
    %494 = vector.broadcast %cst_253 : f32 to vector<4x256xf32>
    %495 = arith.select %493, %491, %494 : vector<4x256xi1>, vector<4x256xf32>
    %c5_254 = arith.constant 5 : index
    %c0_255 = arith.constant 0 : index
    %c0_256 = arith.constant 0 : index
    %496 = vector.load %arg8[%c5_254, %c0_255, %c0_256] : memref<9x4x4xbf16, #tpu.memory_space<vmem>>, vector<1x4x4xbf16>
    %497 = vector.shape_cast %496 : vector<1x4x4xbf16> to vector<4x4xbf16>
    %498 = arith.truncf %495 : vector<4x256xf32> to vector<4x256xbf16>
    %cst_257 = arith.constant dense<0.000000e+00> : vector<4x256xf32>
    %499 = tpu.matmul %497, %498, %cst_257 {dimension_numbers = #tpu.dot_dimension_numbers<[1], [0], [0], [1], [0, 0, 1, 1], [], []>} : vector<4x4xbf16>, vector<4x256xbf16>, vector<4x256xf32> -> vector<4x256xf32>
    %500 = arith.addf %490, %499 : vector<4x256xf32>
    %c241_i32_258 = arith.constant 241 : i32
    %501 = tpu.dynamic_rotate %444 by %c241_i32_258 dim 1 : vector<4x256xf32>, i32 -> vector<4x256xf32>
    %cst_259 = arith.constant 0.000000e+00 : f32
    %502 = vector.shape_cast %131 : vector<1x256xi1> to vector<1x256xi1>
    %503 = vector.broadcast %502 : vector<1x256xi1> to vector<4x256xi1>
    %504 = vector.broadcast %cst_259 : f32 to vector<4x256xf32>
    %505 = arith.select %503, %501, %504 : vector<4x256xi1>, vector<4x256xf32>
    %c6_260 = arith.constant 6 : index
    %c0_261 = arith.constant 0 : index
    %c0_262 = arith.constant 0 : index
    %506 = vector.load %arg8[%c6_260, %c0_261, %c0_262] : memref<9x4x4xbf16, #tpu.memory_space<vmem>>, vector<1x4x4xbf16>
    %507 = vector.shape_cast %506 : vector<1x4x4xbf16> to vector<4x4xbf16>
    %508 = arith.truncf %505 : vector<4x256xf32> to vector<4x256xbf16>
    %cst_263 = arith.constant dense<0.000000e+00> : vector<4x256xf32>
    %509 = tpu.matmul %507, %508, %cst_263 {dimension_numbers = #tpu.dot_dimension_numbers<[1], [0], [0], [1], [0, 0, 1, 1], [], []>} : vector<4x4xbf16>, vector<4x256xbf16>, vector<4x256xf32> -> vector<4x256xf32>
    %510 = arith.addf %500, %509 : vector<4x256xf32>
    %c240_i32_264 = arith.constant 240 : i32
    %511 = tpu.dynamic_rotate %444 by %c240_i32_264 dim 1 : vector<4x256xf32>, i32 -> vector<4x256xf32>
    %cst_265 = arith.constant 0.000000e+00 : f32
    %512 = vector.shape_cast %150 : vector<1x256xi1> to vector<1x256xi1>
    %513 = vector.broadcast %512 : vector<1x256xi1> to vector<4x256xi1>
    %514 = vector.broadcast %cst_265 : f32 to vector<4x256xf32>
    %515 = arith.select %513, %511, %514 : vector<4x256xi1>, vector<4x256xf32>
    %c7_266 = arith.constant 7 : index
    %c0_267 = arith.constant 0 : index
    %c0_268 = arith.constant 0 : index
    %516 = vector.load %arg8[%c7_266, %c0_267, %c0_268] : memref<9x4x4xbf16, #tpu.memory_space<vmem>>, vector<1x4x4xbf16>
    %517 = vector.shape_cast %516 : vector<1x4x4xbf16> to vector<4x4xbf16>
    %518 = arith.truncf %515 : vector<4x256xf32> to vector<4x256xbf16>
    %cst_269 = arith.constant dense<0.000000e+00> : vector<4x256xf32>
    %519 = tpu.matmul %517, %518, %cst_269 {dimension_numbers = #tpu.dot_dimension_numbers<[1], [0], [0], [1], [0, 0, 1, 1], [], []>} : vector<4x4xbf16>, vector<4x256xbf16>, vector<4x256xf32> -> vector<4x256xf32>
    %520 = arith.addf %510, %519 : vector<4x256xf32>
    %c239_i32_270 = arith.constant 239 : i32
    %521 = tpu.dynamic_rotate %444 by %c239_i32_270 dim 1 : vector<4x256xf32>, i32 -> vector<4x256xf32>
    %cst_271 = arith.constant 0.000000e+00 : f32
    %522 = vector.shape_cast %169 : vector<1x256xi1> to vector<1x256xi1>
    %523 = vector.broadcast %522 : vector<1x256xi1> to vector<4x256xi1>
    %524 = vector.broadcast %cst_271 : f32 to vector<4x256xf32>
    %525 = arith.select %523, %521, %524 : vector<4x256xi1>, vector<4x256xf32>
    %c8_272 = arith.constant 8 : index
    %c0_273 = arith.constant 0 : index
    %c0_274 = arith.constant 0 : index
    %526 = vector.load %arg8[%c8_272, %c0_273, %c0_274] : memref<9x4x4xbf16, #tpu.memory_space<vmem>>, vector<1x4x4xbf16>
    %527 = vector.shape_cast %526 : vector<1x4x4xbf16> to vector<4x4xbf16>
    %528 = arith.truncf %525 : vector<4x256xf32> to vector<4x256xbf16>
    %cst_275 = arith.constant dense<0.000000e+00> : vector<4x256xf32>
    %529 = tpu.matmul %527, %528, %cst_275 {dimension_numbers = #tpu.dot_dimension_numbers<[1], [0], [0], [1], [0, 0, 1, 1], [], []>} : vector<4x4xbf16>, vector<4x256xbf16>, vector<4x256xf32> -> vector<4x256xf32>
    %530 = arith.addf %520, %529 : vector<4x256xf32>
    %c0_276 = arith.constant 0 : index
    %c0_277 = arith.constant 0 : index
    %531 = vector.load %arg9[%c0_276, %c0_277] : memref<4x1xf32, #tpu.memory_space<vmem>>, vector<4x1xf32>
    %532 = vector.broadcast %531 : vector<4x1xf32> to vector<4x256xf32>
    %533 = arith.addf %530, %532 : vector<4x256xf32>
    %cst_278 = arith.constant 0.000000e+00 : f32
    %534 = vector.broadcast %cst_278 : f32 to vector<4x256xf32>
    %535 = arith.maximumf %533, %534 : vector<4x256xf32>
    %536 = arith.addf %535, %353 : vector<4x256xf32>
    %cst_279 = arith.constant 0.000000e+00 : f32
    %537 = vector.broadcast %cst_279 : f32 to vector<4x256xf32>
    %538 = arith.maximumf %536, %537 : vector<4x256xf32>
    %c0_280 = arith.constant 0 : index
    %c0_281 = arith.constant 0 : index
    %c0_282 = arith.constant 0 : index
    %539 = vector.load %arg10[%c0_280, %c0_281, %c0_282] : memref<1x4x256xf32, #tpu.memory_space<vmem>>, vector<1x4x256xf32>
    %540 = vector.shape_cast %539 : vector<1x4x256xf32> to vector<4x256xf32>
    %541 = vector.shape_cast %538 : vector<4x256xf32> to vector<1x4x256xf32>
    tpu.vector_store %arg10[%c0_280, %c0_281, %c0_282], %541 {strides = array<i32>} : memref<1x4x256xf32, #tpu.memory_space<vmem>>, vector<1x4x256xf32>,
    return
  }
  func.func @transform_0(%arg0: i32) -> (i32, i32, i32) {
    %c0_i32 = arith.constant 0 : i32
    %c0_i32_0 = arith.constant 0 : i32
    %c0_i32_1 = arith.constant 0 : i32
    return %arg0, %c0_i32, %c0_i32_0 : i32, i32, i32
  }
  func.func @transform_1(%arg0: i32) -> (i32, i32, i32) {
    %c0_i32 = arith.constant 0 : i32
    %c0_i32_0 = arith.constant 0 : i32
    %c0_i32_1 = arith.constant 0 : i32
    %c0_i32_2 = arith.constant 0 : i32
    return %c0_i32, %c0_i32_0, %c0_i32_1 : i32, i32, i32
  }
  func.func @transform_2(%arg0: i32) -> (i32, i32) {
    %c0_i32 = arith.constant 0 : i32
    %c0_i32_0 = arith.constant 0 : i32
    %c0_i32_1 = arith.constant 0 : i32
    return %c0_i32, %c0_i32_0 : i32, i32
  }
  func.func @transform_3(%arg0: i32) -> (i32, i32, i32) {
    %c0_i32 = arith.constant 0 : i32
    %c0_i32_0 = arith.constant 0 : i32
    %c0_i32_1 = arith.constant 0 : i32
    %c0_i32_2 = arith.constant 0 : i32
    return %c0_i32, %c0_i32_0, %c0_i32_1 : i32, i32, i32
  }
  func.func @transform_4(%arg0: i32) -> (i32, i32) {
    %c0_i32 = arith.constant 0 : i32
    %c0_i32_0 = arith.constant 0 : i32
    %c0_i32_1 = arith.constant 0 : i32
    return %c0_i32, %c0_i32_0 : i32, i32
  }
  func.func @transform_5(%arg0: i32) -> (i32, i32, i32) {
    %c0_i32 = arith.constant 0 : i32
    %c0_i32_0 = arith.constant 0 : i32
    %c0_i32_1 = arith.constant 0 : i32
    %c0_i32_2 = arith.constant 0 : i32
    return %c0_i32, %c0_i32_0, %c0_i32_1 : i32, i32, i32
  }
  func.func @transform_6(%arg0: i32) -> (i32, i32) {
    %c0_i32 = arith.constant 0 : i32
    %c0_i32_0 = arith.constant 0 : i32
    %c0_i32_1 = arith.constant 0 : i32
    return %c0_i32, %c0_i32_0 : i32, i32
  }
  func.func @transform_7(%arg0: i32) -> (i32, i32, i32) {
    %c0_i32 = arith.constant 0 : i32
    %c0_i32_0 = arith.constant 0 : i32
    %c0_i32_1 = arith.constant 0 : i32
    %c0_i32_2 = arith.constant 0 : i32
    return %c0_i32, %c0_i32_0, %c0_i32_1 : i32, i32, i32
  }
  func.func @transform_8(%arg0: i32) -> (i32, i32) {
    %c0_i32 = arith.constant 0 : i32
    %c0_i32_0 = arith.constant 0 : i32
    %c0_i32_1 = arith.constant 0 : i32
    return %c0_i32, %c0_i32_0 : i32, i32
  }
  func.func @transform_9(%arg0: i32) -> (i32, i32, i32) {
    %c0_i32 = arith.constant 0 : i32
    %c0_i32_0 = arith.constant 0 : i32
    %c0_i32_1 = arith.constant 0 : i32
    return %arg0, %c0_i32, %c0_i32_0 : i32, i32, i32
  }
}

</mosaic_0001>

<bundles_post_ra>
// kernel: basic_block_forward.1
= control target key start
LH: loop header
LB: loop body
LE: loop exit
PB: predicated region body
PF: predicated region fallthrough
CT: control target
= control target key end

     0   :  { %s3200_s30 = smov 0   ;;  %s4109_s0 = inlined_call_operand.vmem [shape: f32[2,4,256], index: 0, kind: input, shape index: {}]   ;;  %s4110_s1 = inlined_call_operand.vmem [shape: bf16[9,4,4], index: 1, kind: input, shape index: {}]   ;;  %s4111_s2 = inlined_call_operand.vmem [shape: f32[4,1], index: 2, kind: input, shape index: {}]   ;;  %s4112_s3 = inlined_call_operand.vmem [shape: bf16[9,4,4], index: 3, kind: input, shape index: {}]   ;;  %s4113_s4 = inlined_call_operand.vmem [shape: f32[4,1], index: 4, kind: input, shape index: {}]   ;;  %s4114_s5 = inlined_call_operand.vmem [shape: bf16[9,4,4], index: 5, kind: input, shape index: {}]   ;;  %s4115_s6 = inlined_call_operand.vmem [shape: f32[4,1], index: 6, kind: input, shape index: {}]   ;;  %s4116_s7 = inlined_call_operand.vmem [shape: bf16[9,4,4], index: 7, kind: input, shape index: {}]   ;;  %s4117_s8 = inlined_call_operand.vmem [shape: f32[4,1], index: 8, kind: input, shape index: {}]   ;;  %s4118_s9 = inlined_call_operand.vmem [shape: f32[2,4,256], index: 9, kind: output, shape index: {}]  }
   0x1 LB: > { %s2836_s10 = sadd.s32 4294967295, %s3139_s30   ;;  %p2840_p0 = scmp.ge.s32.totalorder %s3139_s30, 1  ;;  %s3139_s30 = sphi %s3200_s30, %s19_s30  }
   0x2   : > { %p287_p1 = scmp.lt.s32.totalorder %s3139_s30, 3 }
   0x4   : > { %p288_p2 = pnand %p2840_p0, %p287_p1 }
   0x5   : > { %p323_p3 = scmp.lt.s32.totalorder (!%p288_p2), %s2836_s10, 1  ;;  %v3141_v1 = vmov (!%p288_p2), 0   ;;  %s3142_s15 = smov (!%p288_p2), 16   ;;  %v1043_v4 = vld [vmem:[%s4111_s2] sm:$0xf] (!%p288_p2)  ;;  %v334_v5 = vlaneseq (!%p288_p2)  ;;  %v4159_v35 = vmov (!%p288_p2), 0 }
   0x6   : > { %291 = sbr.rel (%p288_p2) target bundleno = 1560 (0x618), region = 56  ;;  %514 = vmatprep.mubr.bf16.mxu0 (!%p288_p2), %v3141_v1  ;;  %564 = vmatprep.mubr.bf16.mxu1 (!%p288_p2), %v3141_v1  ;;  %s3143_s16 = smov (!%p288_p2), 15   ;;  %v4161_v36 = vmov (!%p288_p2), 0  ;;  %v4163_v39 = vmov (!%p288_p2), 0  ;;  %v4165_v40 = vmov (!%p288_p2), 0  ;;  %v4167_v41 = vmov (!%p288_p2), 0 }
   0x7   : > { %3010 = vset.pattern.permute.xlu0 (!%p288_p2), %v3141_v1  ;;  %3091 = vset.pattern.permute.xlu1 (!%p288_p2), %v3141_v1  ;;  %s3144_s17 = smov (!%p288_p2), 17   ;;  %s3145_s18 = smov (!%p288_p2), 1   ;;  %v3239_v6 = vand.u32 (!%p288_p2), 127, %v334_v5  ;;  %v4170_v42 = vmov (!%p288_p2), 0  ;;  %v4172_v44 = vmov (!%p288_p2), 0  ;;  %v4180_v50 = vmov (!%p288_p2), 0 }
   0x8   : > { %s3146_s19 = smov (!%p288_p2), 127   ;;  %s3147_s20 = smov (!%p288_p2), 113   ;;  %v4187_v56 = vmov (!%p288_p2), 0  ;;  %v4190_v57 = vmov (!%p288_p2), 0 }
   0x9   : > { %s3148_s21 = smov (!%p288_p2), 112   ;;  %s3149_s22 = smov (!%p288_p2), 111   ;;  %v336_v7 = vadd.s32 (!%p288_p2), 128, %v3239_v6  ;;  %v337_v9 = vcvt.s32.f32 (!%p288_p2), %v3239_v6 }
   0xb   : > { %v338_v8 = vcvt.s32.f32 (!%p288_p2), %v336_v7  ;;  %v339_v11 = vadd.f32 (!%p288_p2), 0.5, %v337_v9 }
   0xd   : > { %s4415_s10 = smov (!%p323_p3, %s2836_s10), 1  ;;  %v340_v10 = vadd.f32 0.5, %v338_v8  ;;  %v342_v13 = vmul.f32 0.0625, %v339_v11  ;;  %v2928_v11 = vld [vmem:[%s4116_s7 + $0x4] sm:$0x3] }
   0xe   : > { %s2951_s11 = sshll.u32 %s4415_s10, 3 }
   0xf   : > { %s327_s14 = scalar_lea.vmem %s4109_s0, %s2951_s11  ;;  %v343_v12 = vmul.f32 0.0625, %v340_v10  ;;  %v344_v15 = vfloor.f32 %v342_v13 }
  0x10   : > { %v3216_v0 = vld [vmem:[%s327_s14] sm:$0xff] }
  0x11   : > { %v3222_v2 = vcombine.high %v3216_v0, %v3216_v0  ;;  %v345_v14 = vfloor.f32 %v343_v12  ;;  %v350_v17 = vadd.f32 0.5, %v344_v15  ;;  %v346_v28 = vmul.f32 16.0, %v344_v15 }
  0x13   : > { %v2970_v3 = vpack.i.bf16 %v3222_v2, %v3216_v0  ;;  %v351_v16 = vadd.f32 0.5, %v345_v14  ;;  %v352_v19 = vmul.f32 0.0625, %v350_v17  ;;  %v347_v25 = vmul.f32 16.0, %v345_v14 }
  0x14   : > { %v3248_v32 = vsub.f32 %v337_v9, %v346_v28  ;;  %v714_v59 = vpack.c.bf16 %v3222_v2, %v3222_v2 }
  0x15   : > { %2971 = vrot.lane.b32.xlu0 %v2970_v3, %s3142_s15  ;;  %2981 = vrot.lane.b32.xlu1 %v2970_v3, %s3143_s16  ;;  %v353_v18 = vmul.f32 0.0625, %v351_v16  ;;  %v354_v21 = vfloor.f32 %v352_v19  ;;  %v3243_v29 = vsub.f32 %v338_v8, %v347_v25  ;;  %v4205_v16 = vmov 0 }
  0x16   : > { %vm4122_vm12 = vcmp.ge.f32.partialorder %v3248_v32, 0.0  ;;  %v3279_v38 = vadd.f32 1.0, %v3248_v32  ;;  %v3314_v45 = vadd.f32 -1.0, %v3248_v32  ;;  %v4216_v25 = vmov 0 }
  0x17   : > { %v355_v20 = vfloor.f32 %v353_v18  ;;  %v356_v23 = vmul.f32 16.0, %v354_v21  ;;  %v3246_v31 = vadd.f32 1.0, %v3243_v29  ;;  %vm4119_vm7 = vcmp.ge.f32.partialorder %v3243_v29, 0.0 }
  0x18   : > { %vm4126_vm10 = vcmp.le.f32.partialorder %v3243_v29, 15.0  ;;  %v3267_v37 = vadd.f32 -1.0, %v3243_v29 }
  0x19   : > { %2976 = vrot.lane.b32.xlu0 %v2970_v3, %s3144_s17  ;;  %2986 = vrot.lane.b32.xlu1 %v2970_v3, %s3145_s18  ;;  %v357_v22 = vmul.f32 16.0, %v355_v20  ;;  %v358_v26 = vsub.f32 %v344_v15, %v356_v23  ;;  %vm4121_vm8 = vcmp.ge.f32.partialorder %v3246_v31, 0.0 }
  0x1b   : > { %v359_v24 = vsub.f32 %v345_v14, %v357_v22  ;;  %v360_v30 = vadd.f32 -1.0, %v358_v26  ;;  %v414_v43 = vadd.f32 1.0, %v358_v26 }
  0x1d   : > { %2991 = vrot.lane.b32.xlu0 %v2970_v3, %s3146_s19  ;;  %2996 = vrot.lane.b32.xlu1 %v2970_v3, %s3147_s20  ;;  %v361_v27 = vadd.f32 -1.0, %v359_v24  ;;  %vm401_vm2 = vcmp.ge.f32.partialorder %v359_v24, 0.0  ;;  %vm403_vm3 = vcmp.le.f32.partialorder %v359_v24, 15.0  ;;  %v415_v33 = vadd.f32 1.0, %v359_v24 }
  0x1e   : > { %vm362_vm4 = vcmp.ge.f32.partialorder %v360_v30, 0.0  ;;  %vm364_vm5 = vcmp.le.f32.partialorder %v360_v30, 15.0  ;;  %vm3256_vm9 = vmand %vm401_vm2, %vm403_vm3 }
  0x1f   : > { %vm363_vm0 = vcmp.ge.f32.partialorder %v361_v27, 0.0  ;;  %vm365_vm1 = vcmp.le.f32.partialorder %v361_v27, 15.0  ;;  %v4160_v35 = vsel %vm3256_vm9, 4294967295, %v4159_v35  ;;  %vm3261_vm11 = vmand %vm362_vm4, %vm364_vm5  ;;  %vm417_vm14 = vcmp.ge.f32.partialorder %v415_v33, 0.0 }
  0x20   : > { %vm3250_vm6 = vmand %vm363_vm0, %vm365_vm1  ;;  %v4162_v36 = vsel %vm3261_vm11, 4294967295, %v4161_v36  ;;  %vm419_vm15 = vcmp.le.f32.partialorder %v415_v33, 15.0  ;;  %vm400_vm0 = vcmp.ge.f32.partialorder %v358_v26, 0.0  ;;  %vm402_vm1 = vcmp.le.f32.partialorder %v358_v26, 15.0  ;;  %v2845_v26 = vld [vmem:[%s4110_s1 + $0x2] sm:$0x3] }
  0x21   : > { %3001 = vrot.lane.b32.xlu0 %v2970_v3, %s3148_s21  ;;  %3006 = vrot.lane.b32.xlu1 %v2970_v3, %s3149_s22  ;;  %vm383_vm13 = vmand %vm3250_vm6, %vm4119_vm7  ;;  %vm4125_vm5 = vcmp.le.f32.partialorder %v3248_v32, 15.0  ;;  %v451_v3 = vld [vmem:[%s4110_s1] sm:$0x3] }
  0x22   : > { %vm393_vm2 = vmand %vm3250_vm6, %vm4121_vm8  ;;  %vm4129_vm8 = vcmp.ge.f32.partialorder %v3267_v37, 0.0 }
  0x23   : > { %vm382_vm4 = vmand %vm3261_vm11, %vm4122_vm12  ;;  %vm4169_vm12 = vcmp.le.f32.partialorder %v3246_v31, 15.0 }
  0x24   : > { %vm3288_vm7 = vmand %vm383_vm13, %vm4126_vm10 }
  0x25   : > { %1046 = vperm.xlu0 %3010, %v1043_v4   ;;  %v4164_v39 = vsel %vm3288_vm7, 4294967295, %v4163_v39  ;;  %vm3292_vm9 = vmand %vm417_vm14, %vm419_vm15  ;;  %vm4130_vm14 = vcmp.ge.f32.partialorder %v3279_v38, 0.0  ;;  %vm4131_vm15 = vcmp.le.f32.partialorder %v3267_v37, 15.0 }
  0x26   : > { %v4166_v40 = vsel %vm3292_vm9, 4294967295, %v4165_v40  ;;  %vm3297_vm3 = vmand %vm400_vm0, %vm402_vm1  ;;  %vm4174_vm0 = vnez %v4160_v35 }
  0x27   : > { %v4168_v41 = vsel %vm3297_vm3, 4294967295, %v4167_v41  ;;  %vm3303_vm11 = vmand %vm393_vm2, %vm4169_vm12  ;;  %vm4132_vm2 = vcmp.lt.s32.totalorder %v3239_v6, 16 }
  0x28   : > { %v4171_v42 = vsel %vm3303_vm11, 4294967295, %v4170_v42  ;;  %vm3309_vm13 = vmand %vm382_vm4, %vm4125_vm5  ;;  %vm4175_vm5 = vnez %v4162_v36 }
  0x29   : > { %v4173_v44 = vsel %vm3309_vm13, 4294967295, %v4172_v44  ;;  %vm373_vm12 = vmand %vm3250_vm6, %vm4129_vm8  ;;  %vm4182_vm6 = vcmp.le.f32.partialorder %v414_v43, 15.0 }
  0x2a   : > { %vm407_vm1 = vmand %vm4174_vm0, %vm4129_vm8  ;;  %vm4183_vm8 = vcmp.ge.f32.partialorder %v414_v43, 0.0  ;;  %v4224_v43 = vmov 0 }
  0x2b   : > { %vm3330_vm10 = vmand %vm4175_vm5, %vm4130_vm14  ;;  %vm4186_vm14 = vcmp.le.f32.partialorder %v3279_v38, 15.0 }
  0x2c   : > { %vm3337_vm13 = vmand %vm373_vm12, %vm4131_vm15 }
  0x2d   : > { %vm3346_vm0 = vmand %vm407_vm1, %vm4131_vm15  ;;  %vm4189_vm15 = vcmp.ge.f32.partialorder %v3243_v29, 0.0 }
  0x2e   : > { %v4181_v50 = vsel %vm3346_vm0, 4294967295, %v4180_v50  ;;  %vm3353_vm3 = vmand %vm4183_vm8, %vm4182_vm6  ;;  %vm4192_vm6 = vcmp.ge.f32.partialorder %v3314_v45, 0.0 }
  0x2f   : > { %vm3361_vm1 = vmand %vm3330_vm10, %vm4186_vm14  ;;  %vm4139_vm10 = vcmp.le.f32.partialorder %v3314_v45, 15.0 }
  0x30   : > { %v4188_v56 = vsel %vm3361_vm1, 4294967295, %v4187_v56  ;;  %vm3369_vm12 = vmand %vm3292_vm9, %vm4189_vm15  ;;  %vm4195_vm15 = vcmp.lt.s32.totalorder %v3239_v6, 15 }
  0x31   : > { %v4191_v57 = vsel %vm3369_vm12, 4294967295, %v4190_v57  ;;  %vm3378_vm4 = vmand %vm4175_vm5, %vm4192_vm6  ;;  %vm4197_vm5 = vcmp.ge.f32.partialorder %v3267_v37, 0.0 }
  0x32   : > { %vm4196_vm8 = vmmov %vm4195_vm15 }
  0x33   : > { %vm3398_vm6 = vmand %vm3292_vm9, %vm4197_vm5  ;;  %vm4202_vm5 = vnez %v4168_v41  ;;  %vm4215_vm9 = vcmp.le.f32.partialorder %v3314_v45, 15.0 }
  0x34   : > { %vm3422_vm14 = vmand %vm3378_vm4, %vm4139_vm10  ;;  %vm4213_vm4 = vcmp.lt.s32.totalorder %v3239_v6, 17 }
  0x35   : > { %v4206_v16 = vsel %vm3422_vm14, 4294967295, %v4205_v16  ;;  %vm4214_vm10 = vmmov %vm4213_vm4 }
  0x87   : > { %v2972_v48 = vpop.permute.xlu0 %2971  ;;  %v2982_v49 = vpop.permute.xlu1 %2981 }
  0x88   : > { %v2974_v51 = vunpack.i.h.bf16 %v2972_v48  ;;  %v2973_v52 = vunpack.i.l.bf16 %v2972_v48  ;;  %v2984_v53 = vunpack.i.h.bf16 %v2982_v49  ;;  %v2983_v54 = vunpack.i.l.bf16 %v2982_v49 }
  0x8a   : > { %v459_v60 = vsel %vm4132_vm2, %v2973_v52, %v2974_v51  ;;  %v578_v61 = vsel %vm4195_vm15, %v2983_v54, %v2984_v53  ;;  %v579_v62 = vsel %vm4196_vm8, %v2984_v53, %v2983_v54  ;;  %v460_v63 = vsel %vm4132_vm2, %v2974_v51, %v2973_v52 }
  0x8b   : > { %v2977_v4 = vpop.permute.xlu0 %2976  ;;  %v466_v5 = vsel %vm3288_vm7, %v459_v60, 0.0  ;;  %v585_v7 = vsel %vm3303_vm11, %v578_v61, 0.0  ;;  %vm4200_vm8 = vnez %v4173_v44  ;;  %v2987_v9 = vpop.permute.xlu1 %2986  ;;  %v584_v10 = vsel %vm3361_vm1, %v579_v62, 0.0 }
  0x8c   : > { %v465_v8 = vsel %vm4200_vm8, %v460_v63, 0.0  ;;  %vm4201_vm15 = vcmp.ge.f32.partialorder %v3314_v45, 0.0  ;;  %v2979_v12 = vunpack.i.h.bf16 %v2977_v4  ;;  %v2978_v13 = vunpack.i.l.bf16 %v2977_v4 }
  0x8d   : > { %vm3414_vm2 = vmand %vm4202_vm5, %vm4201_vm15  ;;  %v470_v14 = vpack.c.bf16 %v466_v5, %v466_v5  ;;  %v469_v15 = vpack.c.bf16 %v465_v8, %v465_v8  ;;  %v2989_v17 = vunpack.i.h.bf16 %v2987_v9  ;;  %v2988_v18 = vunpack.i.l.bf16 %v2987_v9 }
  0x8e   : > { %v589_v19 = vpack.c.bf16 %v585_v7, %v585_v7  ;;  %v588_v20 = vpack.c.bf16 %v584_v10, %v584_v10  ;;  %vm4207_vm15 = vcmp.ge.f32.partialorder %v3246_v31, 0.0  ;;  %vm4208_vm1 = vnez %v4160_v35  ;;  %vm3444_vm12 = vmand %vm3414_vm2, %vm4215_vm9 }
  0x8f   : > { %vm3430_vm8 = vmand %vm4208_vm1, %vm4207_vm15  ;;  %vm4211_vm7 = vcmask 1041408   ;;  %v443_v23 = vsel %vm4213_vm4, %v2978_v13, %v2979_v12  ;;  %v444_v24 = vsel %vm4214_vm10, %v2979_v12, %v2978_v13  ;;  %v4217_v25 = vsel %vm3444_vm12, 4294967295, %v4216_v25  ;;  %v2992_v34 = vpop.permute.xlu0 %2991  ;;  %v2997_v35 = vpop.permute.xlu1 %2996 }
  0x90   : > { %2846 = vmatprep.subr.msk.bf16.mxu0 %vm4211_vm7, %v470_v14  ;;  %vm4212_vm11 = vmmov %vm4211_vm7  ;;  %vm4143_vm1 = vcmp.lt.s32.totalorder %v3239_v6, 113  ;;  %v450_v27 = vsel %vm3337_vm13, %v443_v23, 0.0  ;;  %vm4218_vm7 = vcmp.lt.s32.totalorder %v3239_v6, 1  ;;  %v449_v33 = vsel %vm3422_vm14, %v444_v24, 0.0 }
  0x91   : > { %v477_v22 = vsel %vm4212_vm11, %v469_v15, 0  ;;  %v647_v28 = vsel %vm4218_vm7, %v2988_v18, %v2989_v17  ;;  %vm4219_vm11 = vmmov %vm4218_vm7  ;;  %vm4220_vm9 = vcmp.ge.f32.partialorder %v3279_v38, 0.0  ;;  %vm4223_vm10 = vcmp.le.f32.partialorder %v3267_v37, 15.0 }
  0x92   : > { %483 = vmatpush1.bf16.msra.mxu0 %v477_v22  ;;  %v648_v30 = vsel %vm4219_vm11, %v2989_v17, %v2988_v18  ;;  %vm3464_vm2 = vmand %vm4202_vm5, %vm4220_vm9  ;;  %v453_v46 = vpack.c.bf16 %v450_v27, %v450_v27  ;;  %v654_v48 = vsel %vm3346_vm0, %v647_v28, 0.0  ;;  %v452_v49 = vpack.c.bf16 %v449_v33, %v449_v33  ;;  %v2853_v33 = vld [vmem:[%s4110_s1 + $0x6] sm:$0x3] }
  0x93   : > { %vm3472_vm15 = vmand %vm3398_vm6, %vm4223_vm10  ;;  %vm4226_vm4 = vcmask 1041408   ;;  %v658_v51 = vpack.c.bf16 %v654_v48, %v654_v48  ;;  %vm4228_vm5 = vcmp.le.f32.partialorder %v3246_v31, 15.0  ;;  %v4229_v37 = vmov 0  ;;  %v3002_v8 = vpop.permute.xlu0 %3001  ;;  %v3007_v9 = vpop.permute.xlu1 %3006 }
  0x94   : > { %v4225_v43 = vsel %vm3472_vm15, 4294967295, %v4224_v43  ;;  %2851 = vmatprep.subr.msk.bf16.mxu0 %vm4226_vm4, %v589_v19  ;;  %vm4227_vm7 = vmmov %vm4226_vm4  ;;  %v2994_v52 = vunpack.i.h.bf16 %v2992_v34  ;;  %v2993_v53 = vunpack.i.l.bf16 %v2992_v34  ;;  %v653_v54 = vsel %vm3444_vm12, %v648_v30, 0.0 }
  0x95   : > { %v594_v41 = vsel %vm4227_vm7, %v588_v20, 0  ;;  %vm3484_vm11 = vmand %vm3430_vm8, %vm4228_vm5  ;;  %vm4231_vm6 = vcmask 31744   ;;  %v657_v60 = vpack.c.bf16 %v653_v54, %v653_v54  ;;  %v2999_v61 = vunpack.i.h.bf16 %v2997_v35 }
  0x96   : > { %v4230_v37 = vsel %vm3484_vm11, 4294967295, %v4229_v37  ;;  %2847 = vmatmul.mubr.msk.bf16.vlgmr.msra.gmra.mrb[0].mxu0 %vm4231_vm6, %v2845_v26  ;;  %vm4232_vm9 = vmmov %vm4226_vm4  ;;  %v2998_v62 = vunpack.i.l.bf16 %v2997_v35  ;;  %v4235_v63 = vmov 0  ;;  %vm4237_vm7 = vcmp.lt.s32.totalorder %v3239_v6, 127  ;;  %v2934_v26 = vld [vmem:[%s4116_s7 + $0x8] sm:$0x3] }
  0x97   : > { %2848 = vmatprep.subr.msk.bf16.mxu1 %vm4232_vm9, %v453_v46  ;;  %vm4233_vm10 = vmmov %vm4226_vm4  ;;  %vm4234_vm4 = vcmp.le.f32.partialorder %v3279_v38, 15.0  ;;  %600 = vmatpush1.bf16.msra.mxu0 %v594_v41  ;;  %v772_v4 = vsel %vm4237_vm7, %v2993_v53, %v2994_v52  ;;  %v713_v7 = vpack.c.bf16 %v3216_v0, %v3216_v0  ;;  %vm4242_vm9 = vcmp.le.f32.partialorder %v3243_v29, 15.0 }
  0x98   : > { %v527_v58 = vsel %vm4233_vm10, %v452_v49, 0  ;;  %vm3497_vm8 = vmand %vm3464_vm2, %vm4234_vm4  ;;  %vm4239_vm2 = vcmp.ge.f32.partialorder %v3314_v45, 0.0  ;;  %vm4243_vm10 = vnez %v4191_v57  ;;  %631 = vmatprep.mubr.bf16.mxu0 %v3141_v1  ;;  %v842_v13 = vsel %vm4143_vm1, %v2999_v61, %v2998_v62  ;;  %v2856_v49 = vld [vmem:[%s4110_s1 + $0x8] sm:$0x3] }
  0x99   : > { %v4236_v63 = vsel %vm3497_vm8, 4294967295, %v4235_v63  ;;  %533 = vmatpush1.bf16.msra.mxu1 %v527_v58  ;;  %vm4238_vm5 = vmmov %vm4237_vm7  ;;  %vm4246_vm7 = vcmask 1041408   ;;  %vm4248_vm12 = vcmp.ge.f32.partialorder %v3248_v32, 0.0  ;;  %v848_v57 = vsel %vm3472_vm15, %v842_v13, 0.0 }
  0x9a   : > { %v773_v5 = vsel %vm4238_vm5, %v2994_v52, %v2993_v53  ;;  %vm3514_vm6 = vmand %vm3353_vm3, %vm4239_vm2  ;;  %2854 = vmatprep.subr.msk.bf16.mxu1 %vm4246_vm7, %v658_v51  ;;  %vm4151_vm2 = vcmp.lt.s32.totalorder %v3239_v6, 112  ;;  %v3004_v15 = vunpack.i.h.bf16 %v3002_v8  ;;  %v3003_v17 = vunpack.i.l.bf16 %v3002_v8  ;;  %v2859_v53 = vld [vmem:[%s4110_s1 + $0xa] sm:$0x3] }
  0x9b   : > { %vm3522_vm4 = vmand %vm4243_vm10, %vm4242_vm9  ;;  %v779_v0 = vsel %vm3484_vm11, %v773_v5, 0.0  ;;  %v841_v18 = vsel %vm4143_vm1, %v2998_v62, %v2999_v61  ;;  %v778_v19 = vsel %vm3497_vm8, %v772_v4, 0.0  ;;  %v3009_v20 = vunpack.i.h.bf16 %v3007_v9  ;;  %v2865_v62 = vld [vmem:[%s4110_s1 + $0xe] sm:$0x3] }
  0x9c   : > { %vm4247_vm5 = vmmov %vm4246_vm7  ;;  %v783_v14 = vpack.c.bf16 %v779_v0, %v779_v0  ;;  %vm4252_vm7 = vcmask 31744   ;;  %v3008_v21 = vunpack.i.l.bf16 %v3007_v9  ;;  %v911_v22 = vsel %vm4151_vm2, %v3004_v15, %v3003_v17 }
  0x9d   : > { %v663_v12 = vsel %vm4247_vm5, %v657_v60, 0  ;;  %vm3538_vm9 = vmand %vm3353_vm3, %vm4248_vm12  ;;  %2849 = vmatmul.mubr.msk.bf16.vlgmr.msra.gmra.mrb[0].mxu1 %vm4252_vm7, %v451_v3  ;;  %vm4253_vm12 = vcmp.le.f32.partialorder %v3314_v45, 15.0  ;;  %vm4257_vm7 = vnez %v4166_v40  ;;  %v782_v23 = vpack.c.bf16 %v778_v19, %v778_v19  ;;  %v2862_v60 = vld [vmem:[%s4110_s1 + $0xc] sm:$0x3]  ;;  %v2868_v3 = vld [vmem:[%s4110_s1 + $0x10] sm:$0x3] }
  0x9e   : > { %vm4251_vm10 = vmmov %vm4247_vm5  ;;  %669 = vmatpush1.bf16.msra.mxu1 %v663_v12  ;;  %700 = vmatprep.mubr.bf16.mxu1 %v3141_v1  ;;  %v852_v24 = vpack.c.bf16 %v848_v57, %v848_v57  ;;  %vm4260_vm15 = vcmp.le.f32.partialorder %v3248_v32, 15.0  ;;  %v917_v40 = vsel %vm3522_vm4, %v911_v22, 0.0  ;;  %v910_v28 = vsel %vm4151_vm2, %v3003_v17, %v3004_v15 }
  0x9f   : > { %2857 = vmatprep.subr.msk.bf16.mxu0 %vm4251_vm10, %v714_v59  ;;  %vm3557_vm5 = vmand %vm3514_vm6, %vm4253_vm12  ;;  %v2850_v59 = vld [vmem:[%s4110_s1 + $0x4] sm:$0x3]  ;;  %vm4256_vm10 = vcmp.ge.f32.partialorder %v3246_v31, 0.0  ;;  %vm4150_vm6 = vcmp.lt.s32.totalorder %v3239_v6, 111  ;;  %vm4258_vm12 = vcmask 1041408   ;;  %v921_v35 = vpack.c.bf16 %v917_v40, %v917_v40 }
  0xa0   : > { %vm431_vm1 = vmand %vm4257_vm7, %vm4256_vm10  ;;  %v719_v45 = vsel %vm4258_vm12, %v713_v7, 0  ;;  %v847_v27 = vsel %vm3557_vm5, %v841_v18, 0.0  ;;  %vm4263_vm10 = vcmask 31744   ;;  %v980_v30 = vsel %vm4150_vm6, %v3009_v20, %v3008_v21 }
  0xa1   : > { %vm4259_vm8 = vmmov %vm4258_vm12  ;;  %2852 = vmatmul.mubr.msk.bf16.vlgmr.msra.gmra.mrb[4].mxu0 %vm4263_vm10, %v2850_v59  ;;  %v851_v34 = vpack.c.bf16 %v847_v27, %v847_v27  ;;  %v979_v48 = vsel %vm4150_vm6, %v3008_v21, %v3009_v20  ;;  %vm4287_vm6 = vnez %v4173_v44  ;;  %vm4292_vm2 = vcmask 1041408  }
  0xa2   : > { %2860 = vmatprep.subr.msk.bf16.mxu1 %vm4259_vm8, %v783_v14  ;;  %vm3578_vm0 = vmand %vm3538_vm9, %vm4260_vm15  ;;  %vm4264_vm8 = vcmp.le.f32.partialorder %v3246_v31, 15.0  ;;  %725 = vmatpush1.bf16.msra.mxu0 %v719_v45  ;;  %vm4267_vm15 = vcmp.ge.f32.partialorder %v3279_v38, 0.0  ;;  %v788_v31 = vsel %vm4258_vm12, %v782_v23, 0 }
  0xa3   : > { %vm3591_vm7 = vmand %vm431_vm1, %vm4264_vm8  ;;  %756 = vmatprep.mubr.bf16.mxu0 %v3141_v1  ;;  %v916_v46 = vsel %vm3578_vm0, %v910_v28, 0.0  ;;  %vm4269_vm8 = vcmp.le.f32.partialorder %v3279_v38, 15.0 }
  0xa4   : > { %vm430_vm9 = vmand %vm3353_vm3, %vm4267_vm15  ;;  %v986_v36 = vsel %vm3591_vm7, %v980_v30, 0.0  ;;  %v920_v51 = vpack.c.bf16 %v916_v46, %v916_v46 }
  0xa5   : > { %vm4268_vm1 = vmmov %vm4258_vm12  ;;  %2855 = vmatmul.mubr.msk.bf16.vlgmr.msra.gmra.mrb[4].mxu1 %vm4263_vm10, %v2853_v33  ;;  %v990_v52 = vpack.c.bf16 %v986_v36, %v986_v36 }
  0xa6   : > { %2863 = vmatprep.subr.msk.bf16.mxu0 %vm4268_vm1, %v852_v24  ;;  %vm3616_vm3 = vmand %vm430_vm9, %vm4269_vm8  ;;  %794 = vmatpush1.bf16.msra.mxu1 %v788_v31  ;;  %v926_v54 = vsel %vm4268_vm1, %v920_v51, 0 }
  0xa7   : > { %825 = vmatprep.mubr.bf16.mxu1 %v3141_v1  ;;  %vm4272_vm15 = vmmov %vm4268_vm1  ;;  %v985_v38 = vsel %vm3616_vm3, %v979_v48, 0.0 }
  0xa8   : > { %v857_v41 = vsel %vm4272_vm15, %v851_v34, 0  ;;  %vm4273_vm12 = vmmov %vm4268_vm1  ;;  %v989_v58 = vpack.c.bf16 %v985_v38, %v985_v38 }
  0xa9   : > { %2866 = vmatprep.subr.msk.bf16.mxu1 %vm4273_vm12, %v921_v35  ;;  %vm4274_vm9 = vmmov %vm4263_vm10 }
  0xaa   : > { %2858 = vmatmul.mubr.msk.bf16.vlgmr.msra.gmra.mrb[8].mxu0 %vm4274_vm9, %v2856_v49  ;;  %vm4275_vm10 = vmmov %vm4268_vm1 }
  0xab   : > { %863 = vmatpush1.bf16.msra.mxu0 %v857_v41  ;;  %894 = vmatprep.mubr.bf16.mxu0 %v3141_v1  ;;  %vm4276_vm8 = vmmov %vm4274_vm9 }
  0xac   : > { %2869 = vmatprep.subr.msk.bf16.mxu0 %vm4275_vm10, %v990_v52  ;;  %vm4277_vm15 = vmmov %vm4268_vm1  ;;  %vm4281_vm10 = vcmp.lt.s32.totalorder %v3239_v6, 15 }
  0xad   : > { %2861 = vmatmul.mubr.msk.bf16.vlgmr.msra.gmra.mrb[8].mxu1 %vm4276_vm8, %v2859_v53  ;;  %v995_v61 = vsel %vm4277_vm15, %v989_v58, 0  ;;  %vm4278_vm12 = vmmov %vm4276_vm8  ;;  %vm4283_vm15 = vcmp.lt.s32.totalorder %v3239_v6, 16 }
  0xae   : > { %932 = vmatpush1.bf16.msra.mxu1 %v926_v54  ;;  %963 = vmatprep.mubr.bf16.mxu1 %v3141_v1  ;;  %vm4279_vm9 = vmmov %vm4276_vm8 }
  0xaf   : > { %vm4280_vm1 = vmmov %vm4276_vm8 }
  0xb0   : > { %vm4282_vm8 = vmmov %vm4281_vm10 }
  0xb2   : > { %2864 = vmatmul.mubr.msk.bf16.vlgmr.msra.gmra.mrb[12].mxu0 %vm4278_vm12, %v2862_v60  ;;  %vm4284_vm12 = vmmov %vm4283_vm15 }
  0xb3   : > { %1001 = vmatpush1.bf16.msra.mxu0 %v995_v61  ;;  %1032 = vmatprep.mubr.bf16.mxu0 %v3141_v1 }
  0xb5   : > { %2867 = vmatmul.mubr.msk.bf16.vlgmr.msra.gmra.mrb[12].mxu1 %vm4279_vm9, %v2865_v62  ;;  %vm4285_vm9 = vnez %v4171_v42 }
  0xb6   : > { %1117 = vmatprep.mubr.bf16.mxu1 %v3141_v1 }
  0xba   : > { %2870 = vmatmul.mubr.msk.bf16.vlgmr.msra.gmra.mrb[16].mxu0 %vm4280_vm1, %v2868_v3  ;;  %vm4286_vm1 = vnez %v4164_v39 }
  0xbb   : > { %1167 = vmatprep.mubr.bf16.mxu0 %v3141_v1 }
 0x169   : > { %v516_v4 = vpop.f32.mrb[0].mxu0 }
 0x16a   : > { %v518_v5 = vpop.f32.mrb[1].mxu0 }
 0x16b   : > { %v520_v7 = vpop.f32.mrb[2].mxu0 }
 0x16c   : > { %v521_v8 = vpop.f32.mrb[3].mxu0 }
 0x170   : > { %v566_v9 = vpop.f32.mrb[0].mxu1 }
 0x171   : > { %v567_v10 = vadd.f32 %v566_v9, %v516_v4  ;;  %v568_v0 = vpop.f32.mrb[1].mxu1 }
 0x172   : > { %v569_v12 = vadd.f32 %v568_v0, %v518_v5  ;;  %v570_v13 = vpop.f32.mrb[2].mxu1  ;;  %v1047_v5 = vpop.permute.xlu0 %1046 }
 0x173   : > { %v571_v29 = vpop.f32.mrb[3].mxu1 }
 0x174   : > { %v633_v57 = vpop.f32.mrb[4].mxu0 }
 0x175   : > { %v640_v14 = vadd.f32 %v633_v57, %v567_v10  ;;  %v635_v15 = vpop.f32.mrb[5].mxu0 }
 0x176   : > { %v641_v17 = vadd.f32 %v635_v15, %v569_v12  ;;  %v637_v18 = vpop.f32.mrb[6].mxu0  ;;  %v1616_v15 = vld [vmem:[%s4113_s4] sm:$0xf] }
 0x177   : > { %v638_v19 = vpop.f32.mrb[7].mxu0 }
 0x178   : > { %v702_v20 = vpop.f32.mrb[4].mxu1 }
 0x179   : > { %v709_v21 = vadd.f32 %v702_v20, %v640_v14  ;;  %v704_v59 = vpop.f32.mrb[5].mxu1 }
 0x17a   : > { %v710_v22 = vadd.f32 %v704_v59, %v641_v17  ;;  %v706_v45 = vpop.f32.mrb[6].mxu1 }
 0x17b   : > { %v707_v23 = vpop.f32.mrb[7].mxu1 }
 0x17d   : > { %v758_v24 = vpop.f32.mrb[8].mxu0 }
 0x17e   : > { %v765_v40 = vadd.f32 %v758_v24, %v709_v21  ;;  %v760_v27 = vpop.f32.mrb[9].mxu0 }
 0x17f   : > { %v766_v28 = vadd.f32 %v760_v27, %v710_v22  ;;  %v762_v30 = vpop.f32.mrb[10].mxu0 }
 0x180   : > { %v763_v33 = vpop.f32.mrb[11].mxu0  ;;  %v827_v31 = vpop.f32.mrb[8].mxu1 }
 0x181   : > { %v834_v34 = vadd.f32 %v827_v31, %v765_v40  ;;  %v829_v35 = vpop.f32.mrb[9].mxu1 }
 0x182   : > { %v835_v36 = vadd.f32 %v829_v35, %v766_v28  ;;  %v831_v46 = vpop.f32.mrb[10].mxu1 }
 0x183   : > { %v832_v48 = vpop.f32.mrb[11].mxu1 }
 0x185   : > { %v896_v49 = vpop.f32.mrb[12].mxu0 }
 0x186   : > { %v903_v41 = vadd.f32 %v896_v49, %v834_v34  ;;  %v898_v51 = vpop.f32.mrb[13].mxu0 }
 0x187   : > { %v904_v52 = vadd.f32 %v898_v51, %v835_v36  ;;  %v900_v38 = vpop.f32.mrb[14].mxu0 }
 0x188   : > { %v901_v53 = vpop.f32.mrb[15].mxu0  ;;  %v965_v54 = vpop.f32.mrb[12].mxu1 }
 0x189   : > { %v972_v58 = vadd.f32 %v965_v54, %v903_v41  ;;  %v967_v60 = vpop.f32.mrb[13].mxu1 }
 0x18a   : > { %v973_v61 = vadd.f32 %v967_v60, %v904_v52  ;;  %v969_v62 = vpop.f32.mrb[14].mxu1 }
 0x18b   : > { %v970_v3 = vpop.f32.mrb[15].mxu1 }
 0x18d   : > { %v1034_v4 = vpop.f32.mrb[16].mxu0 }
 0x18e   : > { %v1041_v7 = vadd.f32 %v1034_v4, %v972_v58  ;;  %v1036_v8 = vpop.f32.mrb[17].mxu0 }
 0x18f   : > { %v1042_v9 = vadd.f32 %v1036_v8, %v973_v61  ;;  %v1038_v10 = vpop.f32.mrb[18].mxu0 }
 0x190   : > { %v1049_v0 = vadd.f32 %v1047_v5, %v1041_v7  ;;  %v1039_v12 = vpop.f32.mrb[19].mxu0 }
 0x191   : > { %v1050_v13 = vadd.f32 %v1047_v5, %v1042_v9  ;;  %v2871_v5 = vld [vmem:[%s4112_s3 + $0x2] sm:$0x3] }
 0x192   : > { %v3653_v29 = vmax.f32 %v1049_v0, 0.0 }
 0x193   : > { %v3655_v57 = vmax.f32 %v1050_v13, 0.0 }
 0x195   : > { %v3021_v14 = vpack.i.bf16 %v3655_v57, %v3653_v29  ;;  %v1307_v10 = vpack.c.bf16 %v3655_v57, %v3655_v57 }
 0x197   : > { %3022 = vrot.lane.b32.xlu0 %v3021_v14, %s3143_s16  ;;  %3012 = vrot.lane.b32.xlu1 %v3021_v14, %s3142_s15 }
 0x19b   : > { %3032 = vrot.lane.b32.xlu0 %v3021_v14, %s3146_s19  ;;  %3017 = vrot.lane.b32.xlu1 %v3021_v14, %s3144_s17 }
 0x19f   : > { %3042 = vrot.lane.b32.xlu0 %v3021_v14, %s3148_s21  ;;  %3027 = vrot.lane.b32.xlu1 %v3021_v14, %s3145_s18 }
 0x1a3   : > { %1619 = vperm.xlu0 %3010, %v1616_v15   ;;  %3037 = vrot.lane.b32.xlu1 %v3021_v14, %s3147_s20 }
 0x1a7   : > { %3047 = vrot.lane.b32.xlu1 %v3021_v14, %s3149_s22 }
 0x209   : > { %v3023_v17 = vpop.permute.xlu0 %3022  ;;  %v3013_v18 = vpop.permute.xlu1 %3012 }
 0x20a   : > { %v3025_v19 = vunpack.i.h.bf16 %v3023_v17  ;;  %v3024_v20 = vunpack.i.l.bf16 %v3023_v17  ;;  %v3015_v21 = vunpack.i.h.bf16 %v3013_v18  ;;  %v3014_v59 = vunpack.i.l.bf16 %v3013_v18 }
 0x20c   : > { %v1180_v22 = vsel %vm4281_vm10, %v3024_v20, %v3025_v19  ;;  %v1181_v45 = vsel %vm4282_vm8, %v3025_v19, %v3024_v20  ;;  %v1068_v23 = vsel %vm4283_vm15, %v3014_v59, %v3015_v21  ;;  %v1069_v24 = vsel %vm4284_vm12, %v3015_v21, %v3014_v59  ;;  %v1061_v59 = vld [vmem:[%s4112_s3] sm:$0x3] }
 0x20d   : > { %v1183_v40 = vsel %vm4285_vm9, %v1180_v22, 0.0  ;;  %v1071_v27 = vsel %vm4286_vm1, %v1068_v23, 0.0  ;;  %v3033_v28 = vpop.permute.xlu0 %3032  ;;  %v3018_v30 = vpop.permute.xlu1 %3017  ;;  %v1070_v33 = vsel %vm4287_vm6, %v1069_v24, 0.0  ;;  %vm4288_vm10 = vnez %v4188_v56  ;;  %vm4299_vm9 = vmmov %vm4292_vm2 }
 0x20e   : > { %v1182_v31 = vsel %vm4288_vm10, %v1181_v45, 0.0  ;;  %v3035_v34 = vunpack.i.h.bf16 %v3033_v28  ;;  %v3034_v35 = vunpack.i.l.bf16 %v3033_v28  ;;  %v3020_v36 = vunpack.i.h.bf16 %v3018_v30  ;;  %vm4293_vm10 = vmmov %vm4292_vm2 }
 0x20f   : > { %v3019_v46 = vunpack.i.l.bf16 %v3018_v30  ;;  %v1075_v48 = vpack.c.bf16 %v1071_v27, %v1071_v27  ;;  %v1074_v49 = vpack.c.bf16 %v1070_v33, %v1070_v33  ;;  %vm4289_vm8 = vcmp.lt.s32.totalorder %v3239_v6, 127 }
 0x210   : > { %v1365_v41 = vsel %vm4289_vm8, %v3035_v34, %v3034_v35  ;;  %vm4290_vm15 = vcmp.lt.s32.totalorder %v3239_v6, 17  ;;  %v1187_v38 = vpack.c.bf16 %v1183_v40, %v1183_v40  ;;  %v1186_v62 = vpack.c.bf16 %v1182_v31, %v1182_v31 }
 0x211   : > { %v1057_v51 = vsel %vm4290_vm15, %v3019_v46, %v3020_v36  ;;  %vm4291_vm12 = vmmov %vm4290_vm15  ;;  %2872 = vmatprep.subr.msk.bf16.mxu1 %vm4292_vm2, %v1075_v48  ;;  %v3695_v54 = vpop.permute.xlu0 %3042  ;;  %v3028_v58 = vpop.permute.xlu1 %3027  ;;  %v1080_v60 = vsel %vm4293_vm10, %v1074_v49, 0  ;;  %v1367_v7 = vsel %vm3484_vm11, %v1365_v41, 0.0  ;;  %vm4294_vm10 = vcmp.lt.s32.totalorder %v3239_v6, 1 }
 0x212   : > { %v1058_v52 = vsel %vm4291_vm12, %v3020_v36, %v3019_v46  ;;  %v1060_v53 = vsel %vm3337_vm13, %v1057_v51, 0.0  ;;  %v3030_v3 = vunpack.i.h.bf16 %v3028_v58  ;;  %v3029_v4 = vunpack.i.l.bf16 %v3028_v58  ;;  %1086 = vmatpush1.bf16.msra.mxu1 %v1080_v60  ;;  %vm4295_vm8 = vmmov %vm4294_vm10 }
 0x213   : > { %v1059_v61 = vsel %vm3422_vm14, %v1058_v52, 0.0  ;;  %2877 = vmatprep.subr.msk.bf16.mxu1 %vm4292_vm2, %v1187_v38  ;;  %v1063_v8 = vpack.c.bf16 %v1060_v53, %v1060_v53  ;;  %v3045_v0 = vunpack.i.h.bf16 %v3695_v54  ;;  %v3044_v12 = vunpack.i.l.bf16 %v3695_v54  ;;  %vm4298_vm11 = vmmov %vm4292_vm2  ;;  %v2879_v52 = vld [vmem:[%s4112_s3 + $0x6] sm:$0x3] }
 0x214   : > { %v1062_v9 = vpack.c.bf16 %v1059_v61, %v1059_v61  ;;  %v1244_v13 = vsel %vm4294_vm10, %v3029_v4, %v3030_v3  ;;  %v1245_v14 = vsel %vm4295_vm8, %v3030_v3, %v3029_v4  ;;  %vm4296_vm15 = vnez %v4181_v50  ;;  %vm4302_vm8 = vmmov %vm4292_vm2  ;;  %v2882_v3 = vld [vmem:[%s4112_s3 + $0x8] sm:$0x3] }
 0x215   : > { %v1247_v15 = vsel %vm4296_vm15, %v1244_v13, 0.0  ;;  %vm4297_vm12 = vcmask 31744   ;;  %2874 = vmatprep.subr.msk.bf16.mxu0 %vm4292_vm2, %v1063_v8  ;;  %v3038_v17 = vpop.permute.xlu1 %3037  ;;  %v1192_v18 = vsel %vm4299_vm9, %v1186_v62, 0  ;;  %vm4300_vm6 = vnez %v4217_v25  ;;  %vm4304_vm9 = vmmov %vm4292_vm2 }
 0x216   : > { %2873 = vmatmul.mubr.msk.bf16.vlgmr.msra.gmra.mrb[16].mxu1 %vm4297_vm12, %v2871_v5  ;;  %v1130_v57 = vsel %vm4298_vm11, %v1062_v9, 0  ;;  %v1246_v19 = vsel %vm4300_vm6, %v1245_v14, 0.0  ;;  %v3040_v20 = vunpack.i.h.bf16 %v3038_v17  ;;  %v3039_v21 = vunpack.i.l.bf16 %v3038_v17  ;;  %vm4305_vm12 = vmmov %vm4292_vm2  ;;  %v2888_v14 = vld [vmem:[%s4112_s3 + $0xc] sm:$0x3]  ;;  %v2891_v17 = vld [vmem:[%s4112_s3 + $0xe] sm:$0x3] }
 0x217   : > { %1136 = vmatpush1.bf16.msra.mxu0 %v1130_v57  ;;  %1198 = vmatpush1.bf16.msra.mxu1 %v1192_v18  ;;  %v1251_v22 = vpack.c.bf16 %v1247_v15, %v1247_v15  ;;  %v1250_v45 = vpack.c.bf16 %v1246_v19, %v1246_v19  ;;  %vm4301_vm10 = vcmp.lt.s32.totalorder %v3239_v6, 127  ;;  %vm4303_vm11 = vcmp.lt.s32.totalorder %v3239_v6, 113  ;;  %v2894_v57 = vld [vmem:[%s4112_s3 + $0x10] sm:$0x3] }
 0x218   : > { %v1364_v23 = vsel %vm4301_vm10, %v3034_v35, %v3035_v34  ;;  %2883 = vmatprep.subr.msk.bf16.mxu1 %vm4302_vm8, %v1307_v10  ;;  %1229 = vmatprep.mubr.bf16.mxu1 %v3141_v1  ;;  %v1429_v24 = vsel %vm4303_vm11, %v3040_v20, %v3039_v21  ;;  %vm4306_vm2 = vnez %v4225_v43  ;;  %vm4307_vm6 = vcmask 31744   ;;  %v2876_v34 = vld [vmem:[%s4112_s3 + $0x4] sm:$0x3]  ;;  %v2885_v10 = vld [vmem:[%s4112_s3 + $0xa] sm:$0x3] }
 0x219   : > { %2880 = vmatprep.subr.msk.bf16.mxu0 %vm4304_vm9, %v1251_v22  ;;  %v1256_v40 = vsel %vm4305_vm12, %v1250_v45, 0  ;;  %v1431_v27 = vsel %vm4306_vm2, %v1429_v24, 0.0  ;;  %v3048_v28 = vpop.permute.xlu1 %3047  ;;  %v1371_v30 = vpack.c.bf16 %v1367_v7, %v1367_v7  ;;  %v1306_v33 = vpack.c.bf16 %v3653_v29, %v3653_v29 }
 0x21a   : > { %2875 = vmatmul.mubr.msk.bf16.vlgmr.msra.gmra.mrb[20].mxu0 %vm4307_vm6, %v1061_v59  ;;  %vm4308_vm10 = vcmp.lt.s32.totalorder %v3239_v6, 112  ;;  %vm4309_vm8 = vnez %v4236_v63  ;;  %vm4310_vm6 = vmmov %vm4303_vm11  ;;  %v3050_v46 = vunpack.i.h.bf16 %v3048_v28  ;;  %v3049_v48 = vunpack.i.l.bf16 %v3048_v28 }
 0x21b   : > { %v1493_v31 = vsel %vm4308_vm10, %v3045_v0, %v3044_v12  ;;  %1262 = vmatpush1.bf16.msra.mxu0 %v1256_v40  ;;  %1293 = vmatprep.mubr.bf16.mxu0 %v3141_v1  ;;  %v1366_v35 = vsel %vm4309_vm8, %v1364_v23, 0.0  ;;  %v1428_v36 = vsel %vm4310_vm6, %v3039_v21, %v3040_v20  ;;  %vm4311_vm11 = vmmov %vm4304_vm9  ;;  %v1435_v29 = vpack.c.bf16 %v1431_v27, %v1431_v27 }
 0x21c   : > { %2886 = vmatprep.subr.msk.bf16.mxu0 %vm4311_vm11, %v1371_v30  ;;  %vm4312_vm9 = vcmask 31744   ;;  %vm4313_vm12 = vmmov %vm4311_vm11  ;;  %v1370_v41 = vpack.c.bf16 %v1366_v35, %v1366_v35  ;;  %v1495_v51 = vsel %vm3522_vm4, %v1493_v31, 0.0  ;;  %v1430_v38 = vsel %vm3557_vm5, %v1428_v36, 0.0 }
 0x21d   : > { %v1312_v49 = vsel %vm4313_vm12, %v1306_v33, 0  ;;  %v1492_v53 = vsel %vm4308_vm10, %v3044_v12, %v3045_v0  ;;  %vm4314_vm6 = vcmp.lt.s32.totalorder %v3239_v6, 111  ;;  %vm4315_vm12 = vmmov %vm4311_vm11  ;;  %v1499_v60 = vpack.c.bf16 %v1495_v51, %v1495_v51 }
 0x21e   : > { %2878 = vmatmul.mubr.msk.bf16.vlgmr.msra.gmra.mrb[20].mxu1 %vm4312_vm9, %v2876_v34  ;;  %v1557_v54 = vsel %vm4314_vm6, %v3050_v46, %v3049_v48  ;;  %v1376_v58 = vsel %vm4315_vm12, %v1370_v41, 0  ;;  %v1434_v61 = vpack.c.bf16 %v1430_v38, %v1430_v38  ;;  %v1494_v4 = vsel %vm3578_vm0, %v1492_v53, 0.0  ;;  %vm4316_vm10 = vmmov %vm4314_vm6 }
 0x21f   : > { %1318 = vmatpush1.bf16.msra.mxu1 %v1312_v49  ;;  %1349 = vmatprep.mubr.bf16.mxu1 %v3141_v1  ;;  %v1559_v62 = vsel %vm3591_vm7, %v1557_v54, 0.0  ;;  %v1556_v5 = vsel %vm4316_vm10, %v3049_v48, %v3050_v46  ;;  %vm4317_vm6 = vmmov %vm4311_vm11  ;;  %v1498_v9 = vpack.c.bf16 %v1494_v4, %v1494_v4 }
 0x220   : > { %2889 = vmatprep.subr.msk.bf16.mxu1 %vm4311_vm11, %v1435_v29  ;;  %vm4318_vm11 = vmmov %vm4312_vm9  ;;  %v1563_v8 = vpack.c.bf16 %v1559_v62, %v1559_v62  ;;  %v1558_v0 = vsel %vm3616_vm3, %v1556_v5, 0.0 }
 0x221   : > { %vm4320_vm12 = vmmov %vm4317_vm6  ;;  %v1504_v12 = vsel %vm4317_vm6, %v1498_v9, 0  ;;  %v1562_v13 = vpack.c.bf16 %v1558_v0, %v1558_v0 }
 0x222   : > { %2881 = vmatmul.mubr.msk.bf16.vlgmr.msra.gmra.mrb[24].mxu0 %vm4312_vm9, %v2879_v52  ;;  %vm4319_vm9 = vmmov %vm4317_vm6 }
 0x223   : > { %1382 = vmatpush1.bf16.msra.mxu0 %v1376_v58  ;;  %1413 = vmatprep.mubr.bf16.mxu0 %v3141_v1  ;;  %v1440_v7 = vsel %vm4319_vm9, %v1434_v61, 0  ;;  %vm4321_vm10 = vmmov %vm4318_vm11 }
 0x224   : > { %2892 = vmatprep.subr.msk.bf16.mxu0 %vm4317_vm6, %v1499_v60  ;;  %vm4323_vm9 = vmmov %vm4317_vm6  ;;  %vm4325_vm6 = vcmp.lt.s32.totalorder %v3239_v6, 17 }
 0x225   : > { %v1568_v15 = vsel %vm4323_vm9, %v1562_v13, 0  ;;  %vm4327_vm9 = vcmp.lt.s32.totalorder %v3239_v6, 16 }
 0x226   : > { %2884 = vmatmul.mubr.msk.bf16.vlgmr.msra.gmra.mrb[24].mxu1 %vm4318_vm11, %v2882_v3  ;;  %vm4322_vm11 = vmmov %vm4321_vm10 }
 0x227   : > { %1446 = vmatpush1.bf16.msra.mxu1 %v1440_v7  ;;  %1477 = vmatprep.mubr.bf16.mxu1 %v3141_v1 }
 0x228   : > { %2895 = vmatprep.subr.msk.bf16.mxu1 %vm4320_vm12, %v1563_v8  ;;  %vm4324_vm12 = vmmov %vm4321_vm10 }
 0x22a   : > { %2887 = vmatmul.mubr.msk.bf16.vlgmr.msra.gmra.mrb[28].mxu0 %vm4321_vm10, %v2885_v10 }
 0x22b   : > { %1510 = vmatpush1.bf16.msra.mxu0 %v1504_v12  ;;  %1541 = vmatprep.mubr.bf16.mxu0 %v3141_v1 }
 0x22e   : > { %2890 = vmatmul.mubr.msk.bf16.vlgmr.msra.gmra.mrb[28].mxu1 %vm4322_vm11, %v2888_v14  ;;  %vm4326_vm11 = vmmov %vm4325_vm6 }
 0x22f   : > { %1574 = vmatpush1.bf16.msra.mxu1 %v1568_v15  ;;  %1605 = vmatprep.mubr.bf16.mxu1 %v3141_v1 }
 0x232   : > { %2893 = vmatmul.mubr.msk.bf16.vlgmr.msra.gmra.mrb[32].mxu0 %vm4324_vm12, %v2891_v17  ;;  %vm4328_vm12 = vmmov %vm4327_vm9 }
 0x233   : > { %1690 = vmatprep.mubr.bf16.mxu0 %v3141_v1 }
 0x236   : > { %2896 = vmatmul.mubr.msk.bf16.vlgmr.msra.gmra.mrb[32].mxu1 %vm4321_vm10, %v2894_v57  ;;  %vm4329_vm10 = vnez %v4173_v44 }
 0x237   : > { %1740 = vmatprep.mubr.bf16.mxu1 %v3141_v1 }
 0x2e9   : > { %v1119_v18 = vpop.f32.mrb[16].mxu1 }
 0x2ea   : > { %v1121_v19 = vpop.f32.mrb[17].mxu1 }
 0x2eb   : > { %v1123_v20 = vpop.f32.mrb[18].mxu1 }
 0x2ec   : > { %v1124_v21 = vpop.f32.mrb[19].mxu1 }
 0x2ed   : > { %v1169_v59 = vpop.f32.mrb[20].mxu0  ;;  %v1620_v21 = vpop.permute.xlu0 %1619 }
 0x2ee   : > { %v1170_v22 = vadd.f32 %v1169_v59, %v1119_v18  ;;  %v1171_v45 = vpop.f32.mrb[21].mxu0 }
 0x2ef   : > { %v1172_v23 = vadd.f32 %v1171_v45, %v1121_v19  ;;  %v1173_v24 = vpop.f32.mrb[22].mxu0 }
 0x2f0   : > { %v1174_v40 = vpop.f32.mrb[23].mxu0 }
 0x2f1   : > { %v1231_v27 = vpop.f32.mrb[20].mxu1 }
 0x2f2   : > { %v1238_v28 = vadd.f32 %v1231_v27, %v1170_v22  ;;  %v1233_v30 = vpop.f32.mrb[21].mxu1 }
 0x2f3   : > { %v1239_v33 = vadd.f32 %v1233_v30, %v1172_v23  ;;  %v1235_v31 = vpop.f32.mrb[22].mxu1  ;;  %v2189_v30 = vld [vmem:[%s4115_s6] sm:$0xf] }
 0x2f4   : > { %v1236_v34 = vpop.f32.mrb[23].mxu1 }
 0x2f5   : > { %v1295_v35 = vpop.f32.mrb[24].mxu0 }
 0x2f6   : > { %v1302_v36 = vadd.f32 %v1295_v35, %v1238_v28  ;;  %v1297_v46 = vpop.f32.mrb[25].mxu0 }
 0x2f7   : > { %v1303_v48 = vadd.f32 %v1297_v46, %v1239_v33  ;;  %v1299_v29 = vpop.f32.mrb[26].mxu0 }
 0x2f8   : > { %v1300_v49 = vpop.f32.mrb[27].mxu0 }
 0x2f9   : > { %v1351_v41 = vpop.f32.mrb[24].mxu1 }
 0x2fa   : > { %v1358_v51 = vadd.f32 %v1351_v41, %v1302_v36  ;;  %v1353_v52 = vpop.f32.mrb[25].mxu1 }
 0x2fb   : > { %v1359_v38 = vadd.f32 %v1353_v52, %v1303_v48  ;;  %v1355_v53 = vpop.f32.mrb[26].mxu1 }
 0x2fc   : > { %v1356_v54 = vpop.f32.mrb[27].mxu1 }
 0x2fd   : > { %v1415_v58 = vpop.f32.mrb[28].mxu0 }
 0x2fe   : > { %v1422_v60 = vadd.f32 %v1415_v58, %v1358_v51  ;;  %v1417_v61 = vpop.f32.mrb[29].mxu0 }
 0x2ff   : > { %v1423_v62 = vadd.f32 %v1417_v61, %v1359_v38  ;;  %v1419_v3 = vpop.f32.mrb[30].mxu0 }
 0x300   : > { %v1420_v4 = vpop.f32.mrb[31].mxu0 }
 0x301   : > { %v1479_v5 = vpop.f32.mrb[28].mxu1 }
 0x302   : > { %v1486_v7 = vadd.f32 %v1479_v5, %v1422_v60  ;;  %v1481_v8 = vpop.f32.mrb[29].mxu1 }
 0x303   : > { %v1487_v9 = vadd.f32 %v1481_v8, %v1423_v62  ;;  %v1483_v10 = vpop.f32.mrb[30].mxu1 }
 0x304   : > { %v1484_v0 = vpop.f32.mrb[31].mxu1 }
 0x305   : > { %v1543_v12 = vpop.f32.mrb[32].mxu0 }
 0x306   : > { %v1550_v13 = vadd.f32 %v1543_v12, %v1486_v7  ;;  %v1545_v14 = vpop.f32.mrb[33].mxu0 }
 0x307   : > { %v1551_v15 = vadd.f32 %v1545_v14, %v1487_v9  ;;  %v1547_v17 = vpop.f32.mrb[34].mxu0 }
 0x308   : > { %v1548_v57 = vpop.f32.mrb[35].mxu0 }
 0x309   : > { %v1607_v18 = vpop.f32.mrb[32].mxu1 }
 0x30a   : > { %v1614_v19 = vadd.f32 %v1607_v18, %v1550_v13  ;;  %v1609_v20 = vpop.f32.mrb[33].mxu1 }
 0x30b   : > { %v1615_v59 = vadd.f32 %v1609_v20, %v1551_v15  ;;  %v1611_v22 = vpop.f32.mrb[34].mxu1 }
 0x30c   : > { %v1622_v45 = vadd.f32 %v1620_v21, %v1614_v19  ;;  %v1612_v23 = vpop.f32.mrb[35].mxu1  ;;  %v2897_v22 = vld [vmem:[%s4114_s5 + $0x2] sm:$0x3] }
 0x30d   : > { %v1623_v24 = vadd.f32 %v1620_v21, %v1615_v59 }
 0x30e   : > { %v3805_v40 = vmax.f32 %v1622_v45, 0.0  ;;  %v1634_v45 = vld [vmem:[%s4114_s5] sm:$0x3] }
 0x30f   : > { %v3807_v27 = vmax.f32 %v1623_v24, 0.0 }
 0x311   : > { %v3056_v28 = vpack.i.bf16 %v3807_v27, %v3805_v40 }
 0x313   : > { %3057 = vrot.lane.b32.xlu0 %v3056_v28, %s3144_s17  ;;  %3052 = vrot.lane.b32.xlu1 %v3056_v28, %s3142_s15 }
 0x317   : > { %3067 = vrot.lane.b32.xlu0 %v3056_v28, %s3145_s18  ;;  %3062 = vrot.lane.b32.xlu1 %v3056_v28, %s3143_s16 }
 0x31b   : > { %3077 = vrot.lane.b32.xlu0 %v3056_v28, %s3147_s20  ;;  %3072 = vrot.lane.b32.xlu1 %v3056_v28, %s3146_s19 }
 0x31f   : > { %3087 = vrot.lane.b32.xlu0 %v3056_v28, %s3149_s22  ;;  %3082 = vrot.lane.b32.xlu1 %v3056_v28, %s3148_s21 }
 0x323   : > { %2192 = vperm.xlu1 %3091, %v2189_v30  }
 0x385   : > { %v3058_v33 = vpop.permute.xlu0 %3057  ;;  %v3053_v31 = vpop.permute.xlu1 %3052 }
 0x386   : > { %v3060_v34 = vunpack.i.h.bf16 %v3058_v33  ;;  %v3059_v35 = vunpack.i.l.bf16 %v3058_v33  ;;  %v3055_v36 = vunpack.i.h.bf16 %v3053_v31  ;;  %v3054_v46 = vunpack.i.l.bf16 %v3053_v31 }
 0x388   : > { %v1630_v48 = vsel %vm4325_vm6, %v3059_v35, %v3060_v34  ;;  %v1631_v29 = vsel %vm4326_vm11, %v3060_v34, %v3059_v35  ;;  %v1641_v49 = vsel %vm4327_vm9, %v3054_v46, %v3055_v36  ;;  %v1642_v41 = vsel %vm4328_vm12, %v3055_v36, %v3054_v46 }
 0x389   : > { %v1633_v51 = vsel %vm3337_vm13, %v1630_v48, 0.0  ;;  %v1644_v52 = vsel %vm4286_vm1, %v1641_v49, 0.0  ;;  %v3068_v38 = vpop.permute.xlu0 %3067  ;;  %v3063_v53 = vpop.permute.xlu1 %3062  ;;  %v1632_v54 = vsel %vm3422_vm14, %v1631_v29, 0.0  ;;  %v1643_v58 = vsel %vm4329_vm10, %v1642_v41, 0.0 }
 0x38a   : > { %v3070_v60 = vunpack.i.h.bf16 %v3068_v38  ;;  %v3069_v61 = vunpack.i.l.bf16 %v3068_v38  ;;  %v3065_v62 = vunpack.i.h.bf16 %v3063_v53  ;;  %v3064_v3 = vunpack.i.l.bf16 %v3063_v53 }
 0x38b   : > { %v1648_v4 = vpack.c.bf16 %v1644_v52, %v1644_v52  ;;  %v1636_v5 = vpack.c.bf16 %v1633_v51, %v1633_v51  ;;  %v1635_v7 = vpack.c.bf16 %v1632_v54, %v1632_v54  ;;  %v1647_v8 = vpack.c.bf16 %v1643_v58, %v1643_v58 }
 0x38c   : > { %vm4330_vm6 = vcmp.lt.s32.totalorder %v3239_v6, 1  ;;  %vm4332_vm9 = vcmp.lt.s32.totalorder %v3239_v6, 15  ;;  %vm4334_vm10 = vnez %v4171_v42  ;;  %vm4335_vm14 = vcmask 1041408  }
 0x38d   : > { %v1817_v9 = vsel %vm4330_vm6, %v3069_v61, %v3070_v60  ;;  %vm4331_vm11 = vmmov %vm4330_vm6  ;;  %v1753_v0 = vsel %vm4332_vm9, %v3064_v3, %v3065_v62  ;;  %2898 = vmatprep.subr.msk.bf16.mxu0 %vm4335_vm14, %v1648_v4  ;;  %v3078_v15 = vpop.permute.xlu0 %3077  ;;  %v3073_v57 = vpop.permute.xlu1 %3072  ;;  %v1880_v58 = vpack.c.bf16 %v3807_v27, %v3807_v27 }
 0x38e   : > { %v1818_v10 = vsel %vm4331_vm11, %v3070_v60, %v3069_v61  ;;  %vm4333_vm12 = vmmov %vm4332_vm9  ;;  %v1820_v13 = vsel %vm4296_vm15, %v1817_v9, 0.0  ;;  %v1756_v14 = vsel %vm4334_vm10, %v1753_v0, 0.0  ;;  %v3080_v19 = vunpack.i.h.bf16 %v3078_v15 }
 0x38f   : > { %v1754_v12 = vsel %vm4333_vm12, %v3065_v62, %v3064_v3  ;;  %vm4336_vm1 = vmmov %vm4335_vm14  ;;  %v3079_v20 = vunpack.i.l.bf16 %v3078_v15  ;;  %v3075_v21 = vunpack.i.h.bf16 %v3073_v57  ;;  %v3074_v59 = vunpack.i.l.bf16 %v3073_v57 }
 0x390   : > { %2900 = vmatprep.subr.msk.bf16.mxu1 %vm4336_vm1, %v1636_v5  ;;  %vm4337_vm6 = vmmov %vm4336_vm1  ;;  %v1760_v23 = vpack.c.bf16 %v1756_v14, %v1756_v14  ;;  %v1824_v24 = vpack.c.bf16 %v1820_v13, %v1820_v13  ;;  %vm4339_vm14 = vnez %v4217_v25  ;;  %vm4341_vm9 = vcmp.lt.s32.totalorder %v3239_v6, 127  ;;  %v2902_v5 = vld [vmem:[%s4114_s5 + $0x4] sm:$0x3] }
 0x391   : > { %v1703_v17 = vsel %vm4337_vm6, %v1635_v7, 0  ;;  %vm4338_vm11 = vmmov %vm4336_vm1  ;;  %v1819_v28 = vsel %vm4339_vm14, %v1818_v10, 0.0  ;;  %vm4340_vm1 = vnez %v4188_v56  ;;  %v1937_v33 = vsel %vm4341_vm9, %v3074_v59, %v3075_v21  ;;  %v3083_v36 = vpop.permute.xlu1 %3082  ;;  %v3088_v53 = vpop.permute.xlu0 %3087  ;;  %v2905_v7 = vld [vmem:[%s4114_s5 + $0x6] sm:$0x3] }
 0x392   : > { %v1653_v18 = vsel %vm4338_vm11, %v1647_v8, 0  ;;  %1709 = vmatpush1.bf16.msra.mxu1 %v1703_v17  ;;  %v1755_v30 = vsel %vm4340_vm1, %v1754_v12, 0.0  ;;  %vm4342_vm12 = vmmov %vm4341_vm9  ;;  %vm4343_vm6 = vnez %v4230_v37  ;;  %vm4344_vm11 = vcmask 31744  }
 0x393   : > { %1659 = vmatpush1.bf16.msra.mxu0 %v1653_v18  ;;  %v1938_v31 = vsel %vm4342_vm12, %v3075_v21, %v3074_v59  ;;  %vm4345_vm10 = vmmov %vm4344_vm11  ;;  %v1823_v35 = vpack.c.bf16 %v1819_v28, %v1819_v28  ;;  %v1759_v46 = vpack.c.bf16 %v1755_v30, %v1755_v30  ;;  %vm4346_vm14 = vcmp.lt.s32.totalorder %v3239_v6, 113  ;;  %v2908_v21 = vld [vmem:[%s4114_s5 + $0x8] sm:$0x3]  ;;  %v2911_v59 = vld [vmem:[%s4114_s5 + $0xa] sm:$0x3] }
 0x394   : > { %v1940_v34 = vsel %vm4343_vm6, %v1938_v31, 0.0  ;;  %v2002_v48 = vsel %vm4346_vm14, %v3080_v19, %v3079_v20  ;;  %vm4347_vm1 = vcmask 1041408   ;;  %v3085_v29 = vunpack.i.h.bf16 %v3083_v36  ;;  %v2917_v31 = vld [vmem:[%s4114_s5 + $0xe] sm:$0x3] }
 0x395   : > { %2901 = vmatmul.mubr.msk.bf16.vlgmr.msra.gmra.mrb[36].mxu1 %vm4345_vm10, %v1634_v45  ;;  %2903 = vmatprep.subr.msk.bf16.mxu0 %vm4347_vm1, %v1760_v23  ;;  %vm4348_vm15 = vmmov %vm4347_vm1  ;;  %v3084_v49 = vunpack.i.l.bf16 %v3083_v36  ;;  %v1944_v52 = vpack.c.bf16 %v1940_v34, %v1940_v34  ;;  %v1939_v38 = vsel %vm4309_vm8, %v1937_v33, 0.0  ;;  %vm4351_vm10 = vcmp.lt.s32.totalorder %v3239_v6, 112  ;;  %v2914_v33 = vld [vmem:[%s4114_s5 + $0xc] sm:$0x3] }
 0x396   : > { %2899 = vmatmul.mubr.msk.bf16.vlgmr.msra.gmra.mrb[36].mxu0 %vm4344_vm11, %v2897_v22  ;;  %2906 = vmatprep.subr.msk.bf16.mxu1 %vm4348_vm15, %v1824_v24  ;;  %vm4349_vm9 = vmmov %vm4347_vm1  ;;  %v1879_v61 = vpack.c.bf16 %v3805_v40, %v3805_v40  ;;  %v1943_v62 = vpack.c.bf16 %v1939_v38, %v1939_v38  ;;  %v2001_v3 = vsel %vm4346_vm14, %v3079_v20, %v3080_v19  ;;  %v2004_v4 = vsel %vm4306_vm2, %v2002_v48, 0.0 }
 0x397   : > { %v1829_v41 = vsel %vm4349_vm9, %v1823_v35, 0  ;;  %vm4350_vm12 = vmmov %vm4347_vm1  ;;  %1802 = vmatprep.mubr.bf16.mxu0 %v3141_v1  ;;  %1866 = vmatprep.mubr.bf16.mxu1 %v3141_v1  ;;  %v2066_v54 = vsel %vm4351_vm10, %v3085_v29, %v3084_v49  ;;  %v3090_v8 = vunpack.i.h.bf16 %v3088_v53  ;;  %v3089_v9 = vunpack.i.l.bf16 %v3088_v53  ;;  %v2920_v35 = vld [vmem:[%s4114_s5 + $0x10] sm:$0x3] }
 0x398   : > { %v1765_v51 = vsel %vm4350_vm12, %v1759_v46, 0  ;;  %1835 = vmatpush1.bf16.msra.mxu1 %v1829_v41  ;;  %v2068_v60 = vsel %vm3522_vm4, %v2066_v54, 0.0  ;;  %vm4352_vm15 = vmmov %vm4347_vm1  ;;  %vm4354_vm9 = vcmask 31744   ;;  %v2008_v14 = vpack.c.bf16 %v2004_v4, %v2004_v4 }
 0x399   : > { %1771 = vmatpush1.bf16.msra.mxu0 %v1765_v51  ;;  %2912 = vmatprep.subr.msk.bf16.mxu1 %vm4352_vm15, %v1944_v52  ;;  %vm4353_vm11 = vmmov %vm4351_vm10  ;;  %v2072_v0 = vpack.c.bf16 %v2068_v60, %v2068_v60  ;;  %v2003_v15 = vsel %vm3557_vm5, %v2001_v3, 0.0  ;;  %vm4358_vm14 = vcmp.lt.s32.totalorder %v3239_v6, 111 }
 0x39a   : > { %2909 = vmatprep.subr.msk.bf16.mxu0 %vm4347_vm1, %v1880_v58  ;;  %v2065_v10 = vsel %vm4353_vm11, %v3084_v49, %v3085_v29  ;;  %vm4355_vm12 = vmmov %vm4354_vm9  ;;  %v2130_v57 = vsel %vm4358_vm14, %v3090_v8, %v3089_v9  ;;  %v2007_v18 = vpack.c.bf16 %v2003_v15, %v2003_v15 }
 0x39b   : > { %vm4356_vm10 = vmmov %vm4347_vm1  ;;  %v2067_v17 = vsel %vm3578_vm0, %v2065_v10, 0.0  ;;  %v2132_v20 = vsel %vm3591_vm7, %v2130_v57, 0.0 }
 0x39c   : > { %v1885_v12 = vsel %vm4356_vm10, %v1879_v61, 0  ;;  %vm4357_vm15 = vmmov %vm4347_vm1  ;;  %v2071_v19 = vpack.c.bf16 %v2067_v17, %v2067_v17  ;;  %v2136_v24 = vpack.c.bf16 %v2132_v20, %v2132_v20 }
 0x39d   : > { %2907 = vmatmul.mubr.msk.bf16.vlgmr.msra.gmra.mrb[40].mxu1 %vm4355_vm12, %v2905_v7  ;;  %v1949_v13 = vsel %vm4357_vm15, %v1943_v62, 0  ;;  %vm4359_vm11 = vmmov %vm4347_vm1 }
 0x39e   : > { %2904 = vmatmul.mubr.msk.bf16.vlgmr.msra.gmra.mrb[40].mxu0 %vm4354_vm9, %v2902_v5  ;;  %1955 = vmatpush1.bf16.msra.mxu1 %v1949_v13  ;;  %vm4360_vm9 = vmmov %vm4358_vm14 }
 0x39f   : > { %1891 = vmatpush1.bf16.msra.mxu0 %v1885_v12  ;;  %2918 = vmatprep.subr.msk.bf16.mxu1 %vm4359_vm11, %v2072_v0  ;;  %v2129_v22 = vsel %vm4360_vm9, %v3089_v9, %v3090_v8  ;;  %vm4361_vm10 = vmmov %vm4355_vm12 }
 0x3a0   : > { %2915 = vmatprep.subr.msk.bf16.mxu0 %vm4347_vm1, %v2008_v14  ;;  %1922 = vmatprep.mubr.bf16.mxu0 %v3141_v1  ;;  %vm4362_vm15 = vmmov %vm4347_vm1  ;;  %v2131_v28 = vsel %vm3616_vm3, %v2129_v22, 0.0 }
 0x3a1   : > { %1986 = vmatprep.mubr.bf16.mxu1 %v3141_v1  ;;  %v2013_v45 = vsel %vm4362_vm15, %v2007_v18, 0  ;;  %vm4363_vm14 = vmmov %vm4347_vm1  ;;  %v2135_v30 = vpack.c.bf16 %v2131_v28, %v2131_v28  ;;  %vm4367_vm15 = vcmp.lt.s32.totalorder %v3239_v6, 17 }
 0x3a2   : > { %v2077_v23 = vsel %vm4363_vm14, %v2071_v19, 0  ;;  %vm4364_vm11 = vmmov %vm4361_vm10 }
 0x3a3   : > { %vm4365_vm9 = vmmov %vm4347_vm1 }
 0x3a4   : > { %v2141_v34 = vsel %vm4365_vm9, %v2135_v30, 0  ;;  %vm4368_vm14 = vmmov %vm4367_vm15  ;;  %vm4371_vm9 = vnez %v4164_v39 }
 0x3a5   : > { %2913 = vmatmul.mubr.msk.bf16.vlgmr.msra.gmra.mrb[44].mxu1 %vm4361_vm10, %v2911_v59 }
 0x3a6   : > { %2910 = vmatmul.mubr.msk.bf16.vlgmr.msra.gmra.mrb[44].mxu0 %vm4355_vm12, %v2908_v21  ;;  %2083 = vmatpush1.bf16.msra.mxu1 %v2077_v23  ;;  %vm4366_vm12 = vmmov %vm4361_vm10 }
 0x3a7   : > { %2019 = vmatpush1.bf16.msra.mxu0 %v2013_v45  ;;  %2050 = vmatprep.mubr.bf16.mxu0 %v3141_v1 }
 0x3a8   : > { %2921 = vmatprep.subr.msk.bf16.mxu0 %vm4347_vm1, %v2136_v24  ;;  %2114 = vmatprep.mubr.bf16.mxu1 %v3141_v1  ;;  %vm4369_vm1 = vcmp.lt.s32.totalorder %v3239_v6, 16 }
 0x3ad   : > { %2919 = vmatmul.mubr.msk.bf16.vlgmr.msra.gmra.mrb[48].mxu1 %vm4366_vm12, %v2917_v31  ;;  %vm4372_vm12 = vnez %v4206_v16 }
 0x3ae   : > { %2916 = vmatmul.mubr.msk.bf16.vlgmr.msra.gmra.mrb[48].mxu0 %vm4364_vm11, %v2914_v33  ;;  %2263 = vmatprep.mubr.bf16.mxu1 %v3141_v1  ;;  %vm4370_vm11 = vmmov %vm4369_vm1 }
 0x3af   : > { %2147 = vmatpush1.bf16.msra.mxu0 %v2141_v34  ;;  %2178 = vmatprep.mubr.bf16.mxu0 %v3141_v1 }
 0x3b6   : > { %2922 = vmatmul.mubr.msk.bf16.vlgmr.msra.gmra.mrb[52].mxu0 %vm4361_vm10, %v2920_v35  ;;  %vm4373_vm10 = vnez %v4173_v44 }
 0x3b7   : > { %2313 = vmatprep.mubr.bf16.mxu0 %v3141_v1 }
 0x468   : > { %v1742_v46 = vpop.f32.mrb[36].mxu1 }
 0x469   : > { %v1692_v36 = vpop.f32.mrb[36].mxu0  ;;  %v1744_v49 = vpop.f32.mrb[37].mxu1 }
 0x46a   : > { %v1743_v48 = vadd.f32 %v1742_v46, %v1692_v36  ;;  %v1694_v29 = vpop.f32.mrb[37].mxu0  ;;  %v1746_v52 = vpop.f32.mrb[38].mxu1 }
 0x46b   : > { %v1745_v41 = vadd.f32 %v1744_v49, %v1694_v29  ;;  %v1696_v51 = vpop.f32.mrb[38].mxu0  ;;  %v1747_v53 = vpop.f32.mrb[39].mxu1 }
 0x46c   : > { %v1697_v38 = vpop.f32.mrb[39].mxu0  ;;  %v2193_v29 = vpop.permute.xlu1 %2192 }
 0x470   : > { %v1868_v58 = vpop.f32.mrb[40].mxu1 }
 0x471   : > { %v1804_v54 = vpop.f32.mrb[40].mxu0  ;;  %v1870_v62 = vpop.f32.mrb[41].mxu1 }
 0x472   : > { %v1811_v60 = vadd.f32 %v1804_v54, %v1743_v48  ;;  %v1806_v61 = vpop.f32.mrb[41].mxu0  ;;  %v1872_v5 = vpop.f32.mrb[42].mxu1 }
 0x473   : > { %v1812_v3 = vadd.f32 %v1806_v61, %v1745_v41  ;;  %v1808_v4 = vpop.f32.mrb[42].mxu0  ;;  %v1873_v9 = vpop.f32.mrb[43].mxu1 }
 0x474   : > { %v1875_v7 = vadd.f32 %v1868_v58, %v1811_v60  ;;  %v1809_v8 = vpop.f32.mrb[43].mxu0 }
 0x475   : > { %v1876_v10 = vadd.f32 %v1870_v62, %v1812_v3  ;;  %v2762_v62 = vld [vmem:[%s4117_s8] sm:$0xf] }
 0x478   : > { %v1988_v12 = vpop.f32.mrb[44].mxu1 }
 0x479   : > { %v1924_v0 = vpop.f32.mrb[44].mxu0  ;;  %v1990_v15 = vpop.f32.mrb[45].mxu1 }
 0x47a   : > { %v1931_v13 = vadd.f32 %v1924_v0, %v1875_v7  ;;  %v1926_v14 = vpop.f32.mrb[45].mxu0  ;;  %v1992_v18 = vpop.f32.mrb[46].mxu1 }
 0x47b   : > { %v1932_v17 = vadd.f32 %v1926_v14, %v1876_v10  ;;  %v1928_v57 = vpop.f32.mrb[46].mxu0  ;;  %v1993_v21 = vpop.f32.mrb[47].mxu1 }
 0x47c   : > { %v1995_v19 = vadd.f32 %v1988_v12, %v1931_v13  ;;  %v1929_v20 = vpop.f32.mrb[47].mxu0 }
 0x47d   : > { %v1996_v59 = vadd.f32 %v1990_v15, %v1932_v17 }
 0x480   : > { %v2116_v45 = vpop.f32.mrb[48].mxu1 }
 0x481   : > { %v2052_v22 = vpop.f32.mrb[48].mxu0  ;;  %v2118_v28 = vpop.f32.mrb[49].mxu1 }
 0x482   : > { %v2059_v23 = vadd.f32 %v2052_v22, %v1995_v19  ;;  %v2054_v24 = vpop.f32.mrb[49].mxu0  ;;  %v2120_v31 = vpop.f32.mrb[50].mxu1 }
 0x483   : > { %v2060_v30 = vadd.f32 %v2054_v24, %v1996_v59  ;;  %v2056_v33 = vpop.f32.mrb[50].mxu0  ;;  %v2121_v36 = vpop.f32.mrb[51].mxu1 }
 0x484   : > { %v2123_v34 = vadd.f32 %v2116_v45, %v2059_v23  ;;  %v2057_v35 = vpop.f32.mrb[51].mxu0 }
 0x485   : > { %v2124_v46 = vadd.f32 %v2118_v28, %v2060_v30 }
 0x489   : > { %v2180_v48 = vpop.f32.mrb[52].mxu0 }
 0x48a   : > { %v2187_v49 = vadd.f32 %v2180_v48, %v2123_v34  ;;  %v2182_v41 = vpop.f32.mrb[53].mxu0 }
 0x48b   : > { %v2188_v51 = vadd.f32 %v2182_v41, %v2124_v46  ;;  %v2184_v52 = vpop.f32.mrb[54].mxu0 }
 0x48c   : > { %v2195_v38 = vadd.f32 %v2193_v29, %v2187_v49  ;;  %v2185_v53 = vpop.f32.mrb[55].mxu0 }
 0x48d   : > { %v2196_v54 = vadd.f32 %v2193_v29, %v2188_v51 }
 0x48e   : > { %v3953_v58 = vmax.f32 %v2195_v38, 0.0 }
 0x48f   : > { %v3955_v60 = vmax.f32 %v2196_v54, 0.0 }
 0x491   : > { %v3097_v61 = vpack.i.bf16 %v3955_v60, %v3953_v58 }
 0x493   : > { %3098 = vrot.lane.b32.xlu1 %v3097_v61, %s3144_s17  ;;  %3093 = vrot.lane.b32.xlu0 %v3097_v61, %s3142_s15  ;;  %s332_s17 = scalar_lea.vmem %s4118_s9, %s2951_s11 }
 0x497   : > { %3108 = vrot.lane.b32.xlu1 %v3097_v61, %s3145_s18  ;;  %3103 = vrot.lane.b32.xlu0 %v3097_v61, %s3143_s16 }
 0x49b   : > { %3118 = vrot.lane.b32.xlu1 %v3097_v61, %s3147_s20  ;;  %3113 = vrot.lane.b32.xlu0 %v3097_v61, %s3146_s19 }
 0x49f   : > { %3128 = vrot.lane.b32.xlu1 %v3097_v61, %s3149_s22  ;;  %3123 = vrot.lane.b32.xlu0 %v3097_v61, %s3148_s21 }
 0x4a3   : > { %2765 = vperm.xlu0 %3010, %v2762_v62  }
 0x505   : > { %v3099_v3 = vpop.permute.xlu1 %3098  ;;  %v3094_v4 = vpop.permute.xlu0 %3093 }
 0x506   : > { %v3101_v5 = vunpack.i.h.bf16 %v3099_v3  ;;  %v3100_v7 = vunpack.i.l.bf16 %v3099_v3  ;;  %v3096_v8 = vunpack.i.h.bf16 %v3094_v4  ;;  %v3095_v9 = vunpack.i.l.bf16 %v3094_v4 }
 0x508   : > { %v2203_v10 = vsel %vm4367_vm15, %v3100_v7, %v3101_v5  ;;  %v2204_v0 = vsel %vm4368_vm14, %v3101_v5, %v3100_v7  ;;  %v2214_v12 = vsel %vm4369_vm1, %v3095_v9, %v3096_v8  ;;  %v2215_v13 = vsel %vm4370_vm11, %v3096_v8, %v3095_v9 }
 0x509   : > { %v2206_v14 = vsel %vm3337_vm13, %v2203_v10, 0.0  ;;  %v2217_v15 = vsel %vm4371_vm9, %v2214_v12, 0.0  ;;  %v3109_v17 = vpop.permute.xlu1 %3108  ;;  %v3104_v57 = vpop.permute.xlu0 %3103  ;;  %v2205_v18 = vsel %vm4372_vm12, %v2204_v0, 0.0  ;;  %v2216_v19 = vsel %vm4373_vm10, %v2215_v13, 0.0 }
 0x50a   : > { %v3111_v20 = vunpack.i.h.bf16 %v3109_v17  ;;  %v3110_v21 = vunpack.i.l.bf16 %v3109_v17  ;;  %v3106_v59 = vunpack.i.h.bf16 %v3104_v57  ;;  %v3105_v22 = vunpack.i.l.bf16 %v3104_v57 }
 0x50b   : > { %v2221_v45 = vpack.c.bf16 %v2217_v15, %v2217_v15  ;;  %v2209_v23 = vpack.c.bf16 %v2206_v14, %v2206_v14  ;;  %v2208_v24 = vpack.c.bf16 %v2205_v18, %v2205_v18  ;;  %v2220_v47 = vpack.c.bf16 %v2216_v19, %v2216_v19 }
 0x50c   : > { %vm4374_vm13 = vcmp.lt.s32.totalorder %v3239_v6, 1  ;;  %vm4376_vm14 = vcmp.lt.s32.totalorder %v3239_v6, 15  ;;  %vm4378_vm11 = vnez %v4181_v50  ;;  %vm4379_vm9 = vnez %v4171_v42  ;;  %v2923_v42 = vld [vmem:[%s4116_s7 + $0x2] sm:$0x3]  ;;  %v2207_v50 = vld [vmem:[%s4116_s7] sm:$0x3] }
 0x50d   : > { %v2390_v39 = vsel %vm4374_vm13, %v3110_v21, %v3111_v20  ;;  %vm4375_vm15 = vmmov %vm4374_vm13  ;;  %v2326_v16 = vsel %vm4376_vm14, %v3105_v22, %v3106_v59  ;;  %vm4380_vm12 = vcmask 1041408   ;;  %v3119_v31 = vpop.permute.xlu1 %3118  ;;  %v3114_v35 = vpop.permute.xlu0 %3113  ;;  %v2453_v12 = vpack.c.bf16 %v3955_v60, %v3955_v60  ;;  %v2931_v60 = vld [vmem:[%s4116_s7 + $0x6] sm:$0x3] }
 0x50e   : > { %v2391_v28 = vsel %vm4375_vm15, %v3111_v20, %v3110_v21  ;;  %vm4377_vm1 = vmmov %vm4376_vm14  ;;  %v2393_v30 = vsel %vm4378_vm11, %v2390_v39, 0.0  ;;  %v2329_v33 = vsel %vm4379_vm9, %v2326_v16, 0.0  ;;  %2924 = vmatprep.subr.msk.bf16.mxu1 %vm4380_vm12, %v2221_v45  ;;  %v3121_v46 = vunpack.i.h.bf16 %v3119_v31 }
 0x50f   : > { %v2327_v44 = vsel %vm4377_vm1, %v3106_v59, %v3105_v22  ;;  %vm4381_vm10 = vmmov %vm4380_vm12  ;;  %v3120_v48 = vunpack.i.l.bf16 %v3119_v31  ;;  %v3116_v29 = vunpack.i.h.bf16 %v3114_v35  ;;  %v3115_v49 = vunpack.i.l.bf16 %v3114_v35  ;;  %v2946_v31 = vld [vmem:[%s4116_s7 + $0x10] sm:$0x3] }
 0x510   : > { %2926 = vmatprep.subr.msk.bf16.mxu0 %vm4381_vm10, %v2209_v23  ;;  %vm4382_vm13 = vmmov %vm4381_vm10  ;;  %v2333_v41 = vpack.c.bf16 %v2329_v33, %v2329_v33  ;;  %v2397_v51 = vpack.c.bf16 %v2393_v30, %v2393_v30  ;;  %vm4384_vm14 = vnez %v4217_v25  ;;  %vm4385_vm1 = vnez %v4188_v56  ;;  %v2940_v30 = vld [vmem:[%s4116_s7 + $0xc] sm:$0x3]  ;;  %v2943_v33 = vld [vmem:[%s4116_s7 + $0xe] sm:$0x3] }
 0x511   : > { %v2276_v34 = vsel %vm4382_vm13, %v2208_v24, 0  ;;  %vm4383_vm15 = vmmov %vm4381_vm10  ;;  %v2392_v52 = vsel %vm4384_vm14, %v2391_v28, 0.0  ;;  %v2328_v38 = vsel %vm4385_vm1, %v2327_v44, 0.0  ;;  %vm4386_vm11 = vcmp.lt.s32.totalorder %v3239_v6, 127  ;;  %v3124_v3 = vpop.permute.xlu0 %3123  ;;  %v3129_v10 = vpop.permute.xlu1 %3128 }
 0x512   : > { %v2226_v36 = vsel %vm4383_vm15, %v2220_v47, 0  ;;  %2282 = vmatpush1.bf16.msra.mxu0 %v2276_v34  ;;  %v2510_v53 = vsel %vm4386_vm11, %v3115_v49, %v3116_v29  ;;  %vm4387_vm9 = vmmov %vm4386_vm11  ;;  %vm4388_vm12 = vcmask 31744   ;;  %v2396_v62 = vpack.c.bf16 %v2392_v52, %v2392_v52  ;;  %v2937_v47 = vld [vmem:[%s4116_s7 + $0xa] sm:$0x3] }
 0x513   : > { %2232 = vmatpush1.bf16.msra.mxu1 %v2226_v36  ;;  %v2511_v54 = vsel %vm4387_vm9, %v3116_v29, %v3115_v49  ;;  %vm4389_vm10 = vmmov %vm4388_vm12  ;;  %v2332_v25 = vpack.c.bf16 %v2328_v38, %v2328_v38  ;;  %vm4390_vm13 = vcmp.lt.s32.totalorder %v3239_v6, 113  ;;  %v3126_v4 = vunpack.i.h.bf16 %v3124_v3 }
 0x514   : > { %v2513_v61 = vsel %vm4343_vm6, %v2511_v54, 0.0  ;;  %v2575_v56 = vsel %vm4390_vm13, %v3121_v46, %v3120_v48  ;;  %2929 = vmatprep.subr.msk.bf16.mxu1 %vm4383_vm15, %v2333_v41  ;;  %vm4391_vm14 = vmmov %vm4383_vm15  ;;  %v3125_v5 = vunpack.i.l.bf16 %v3124_v3  ;;  %v2512_v9 = vsel %vm4309_vm8, %v2510_v53, 0.0 }
 0x515   : > { %2927 = vmatmul.mubr.msk.bf16.vlgmr.msra.gmra.mrb[56].mxu0 %vm4389_vm10, %v2207_v50  ;;  %2932 = vmatprep.subr.msk.bf16.mxu0 %vm4391_vm14, %v2397_v51  ;;  %vm4392_vm1 = vmmov %vm4391_vm14  ;;  %v2517_v8 = vpack.c.bf16 %v2513_v61, %v2513_v61  ;;  %vm4394_vm6 = vcmp.lt.s32.totalorder %v3239_v6, 112  ;;  %v2452_v14 = vpack.c.bf16 %v3953_v58, %v3953_v58  ;;  %v2516_v15 = vpack.c.bf16 %v2512_v9, %v2512_v9 }
 0x516   : > { %2925 = vmatmul.mubr.msk.bf16.vlgmr.msra.gmra.mrb[52].mxu1 %vm4388_vm12, %v2923_v42  ;;  %v2402_v7 = vsel %vm4392_vm1, %v2396_v62, 0  ;;  %vm4393_vm11 = vmmov %vm4392_vm1  ;;  %2439 = vmatprep.mubr.bf16.mxu0 %v3141_v1  ;;  %v2639_v0 = vsel %vm4394_vm6, %v3126_v4, %v3125_v5  ;;  %v2577_v17 = vsel %vm4306_vm2, %v2575_v56, 0.0  ;;  %v3131_v57 = vunpack.i.h.bf16 %v3129_v10 }
 0x517   : > { %v2338_v37 = vsel %vm4393_vm11, %v2332_v25, 0  ;;  %2375 = vmatprep.mubr.bf16.mxu1 %v3141_v1  ;;  %2408 = vmatpush1.bf16.msra.mxu0 %v2402_v7  ;;  %v2641_v13 = vsel %vm3522_vm4, %v2639_v0, 0.0  ;;  %vm4395_vm9 = vmmov %vm4392_vm1  ;;  %v3130_v18 = vunpack.i.l.bf16 %v3129_v10  ;;  %v2581_v21 = vpack.c.bf16 %v2577_v17, %v2577_v17 }
 0x518   : > { %2344 = vmatpush1.bf16.msra.mxu1 %v2338_v37  ;;  %2938 = vmatprep.subr.msk.bf16.mxu0 %vm4395_vm9, %v2517_v8  ;;  %vm4396_vm8 = vmmov %vm4390_vm13  ;;  %v2645_v19 = vpack.c.bf16 %v2641_v13, %v2641_v13  ;;  %vm4402_vm14 = vcmp.lt.s32.totalorder %v3239_v6, 111 }
 0x519   : > { %v2574_v63 = vsel %vm4396_vm8, %v3120_v48, %v3121_v46  ;;  %vm4397_vm12 = vmmov %vm4392_vm1  ;;  %v2703_v45 = vsel %vm4402_vm14, %v3131_v57, %v3130_v18 }
 0x51a   : > { %2935 = vmatprep.subr.msk.bf16.mxu1 %vm4397_vm12, %v2453_v12  ;;  %vm4398_vm4 = vmmov %vm4394_vm6  ;;  %v2576_v59 = vsel %vm3557_vm5, %v2574_v63, 0.0  ;;  %v2705_v2 = vsel %vm3591_vm7, %v2703_v45, 0.0 }
 0x51b   : > { %v2638_v58 = vsel %vm4398_vm4, %v3125_v5, %v3126_v4  ;;  %vm4399_vm13 = vmmov %vm4389_vm10  ;;  %v2580_v23 = vpack.c.bf16 %v2576_v59, %v2576_v59  ;;  %v2709_v28 = vpack.c.bf16 %v2705_v2, %v2705_v2 }
 0x51c   : > { %vm4400_vm2 = vmmov %vm4392_vm1  ;;  %v2640_v22 = vsel %vm3578_vm0, %v2638_v58, 0.0 }
 0x51d   : > { %2933 = vmatmul.mubr.msk.bf16.vlgmr.msra.gmra.mrb[60].mxu0 %vm4399_vm13, %v2931_v60  ;;  %v2458_v43 = vsel %vm4400_vm2, %v2452_v14, 0  ;;  %vm4401_vm15 = vmmov %vm4392_vm1  ;;  %v2644_v24 = vpack.c.bf16 %v2640_v22, %v2640_v22 }
 0x51e   : > { %2930 = vmatmul.mubr.msk.bf16.vlgmr.msra.gmra.mrb[56].mxu1 %vm4389_vm10, %v2928_v11  ;;  %v2522_v20 = vsel %vm4401_vm15, %v2516_v15, 0  ;;  %vm4403_vm11 = vmmov %vm4392_vm1  ;;  %2559 = vmatprep.mubr.bf16.mxu0 %v3141_v1 }
 0x51f   : > { %2464 = vmatpush1.bf16.msra.mxu1 %v2458_v43  ;;  %2528 = vmatpush1.bf16.msra.mxu0 %v2522_v20  ;;  %vm4404_vm0 = vmmov %vm4402_vm14 }
 0x520   : > { %2941 = vmatprep.subr.msk.bf16.mxu1 %vm4392_vm1, %v2581_v21  ;;  %2944 = vmatprep.subr.msk.bf16.mxu0 %vm4403_vm11, %v2645_v19  ;;  %v2702_v39 = vsel %vm4404_vm0, %v3130_v18, %v3131_v57  ;;  %vm4405_vm5 = vmmov %vm4389_vm10 }
 0x521   : > { %2495 = vmatprep.mubr.bf16.mxu1 %v3141_v1  ;;  %vm4406_vm6 = vmmov %vm4405_vm5  ;;  %v2704_v44 = vsel %vm3616_vm3, %v2702_v39, 0.0 }
 0x522   : > { %vm4407_vm9 = vmmov %vm4392_vm1  ;;  %v2708_v6 = vpack.c.bf16 %v2704_v44, %v2704_v44  ;;  %v2766_v2 = vpop.permute.xlu0 %2765 }
 0x523   : > { %v2586_v16 = vsel %vm4407_vm9, %v2580_v23, 0  ;;  %vm4408_vm8 = vmmov %vm4392_vm1 }
 0x524   : > { %v2650_v32 = vsel %vm4408_vm8, %v2644_v24, 0  ;;  %vm4409_vm7 = vmmov %vm4392_vm1 }
 0x525   : > { %2939 = vmatmul.mubr.msk.bf16.vlgmr.msra.gmra.mrb[64].mxu0 %vm4406_vm6, %v2937_v47  ;;  %vm4410_vm12 = vmmov %vm4405_vm5 }
 0x526   : > { %2936 = vmatmul.mubr.msk.bf16.vlgmr.msra.gmra.mrb[60].mxu1 %vm4405_vm5, %v2934_v26  ;;  %2656 = vmatpush1.bf16.msra.mxu0 %v2650_v32  ;;  %vm4411_vm4 = vmmov %vm4392_vm1 }
 0x527   : > { %2592 = vmatpush1.bf16.msra.mxu1 %v2586_v16  ;;  %2623 = vmatprep.mubr.bf16.mxu1 %v3141_v1  ;;  %v2714_v55 = vsel %vm4411_vm4, %v2708_v6, 0  ;;  %vm4412_vm3 = vmmov %vm4405_vm5 }
 0x528   : > { %2947 = vmatprep.subr.msk.bf16.mxu1 %vm4409_vm7, %v2709_v28  ;;  %2687 = vmatprep.mubr.bf16.mxu0 %v3141_v1  ;;  %vm4413_vm10 = vmmov %vm4412_vm3 }
 0x52d   : > { %2945 = vmatmul.mubr.msk.bf16.vlgmr.msra.gmra.mrb[68].mxu0 %vm4412_vm3, %v2943_v33 }
 0x52e   : > { %2942 = vmatmul.mubr.msk.bf16.vlgmr.msra.gmra.mrb[64].mxu1 %vm4410_vm12, %v2940_v30 }
 0x52f   : > { %2720 = vmatpush1.bf16.msra.mxu1 %v2714_v55  ;;  %2751 = vmatprep.mubr.bf16.mxu1 %v3141_v1 }
 0x536   : > { %2948 = vmatmul.mubr.msk.bf16.vlgmr.msra.gmra.mrb[68].mxu1 %vm4413_vm10, %v2946_v31 }
 0x5e8   : > { %v2315_v35 = vpop.f32.mrb[56].mxu0 }
 0x5e9   : > { %v2265_v34 = vpop.f32.mrb[52].mxu1  ;;  %v2317_v48 = vpop.f32.mrb[57].mxu0 }
 0x5ea   : > { %v2267_v36 = vpop.f32.mrb[53].mxu1  ;;  %v2316_v46 = vadd.f32 %v2315_v35, %v2265_v34  ;;  %v2319_v42 = vpop.f32.mrb[58].mxu0 }
 0x5eb   : > { %v2269_v29 = vpop.f32.mrb[54].mxu1  ;;  %v2318_v49 = vadd.f32 %v2317_v48, %v2267_v36  ;;  %v2320_v41 = vpop.f32.mrb[59].mxu0 }
 0x5ec   : > { %v2270_v50 = vpop.f32.mrb[55].mxu1 }
 0x5f0   : > { %v2441_v52 = vpop.f32.mrb[60].mxu0 }
 0x5f1   : > { %v2377_v51 = vpop.f32.mrb[56].mxu1  ;;  %v2443_v53 = vpop.f32.mrb[61].mxu0 }
 0x5f2   : > { %v2384_v38 = vadd.f32 %v2377_v51, %v2316_v46  ;;  %v2379_v1 = vpop.f32.mrb[57].mxu1  ;;  %v2445_v62 = vpop.f32.mrb[62].mxu0 }
 0x5f3   : > { %v2385_v54 = vadd.f32 %v2379_v1, %v2318_v49  ;;  %v2381_v61 = vpop.f32.mrb[58].mxu1  ;;  %v2446_v56 = vpop.f32.mrb[63].mxu0 }
 0x5f4   : > { %v2448_v3 = vadd.f32 %v2441_v52, %v2384_v38  ;;  %v2382_v25 = vpop.f32.mrb[59].mxu1 }
 0x5f5   : > { %v2449_v4 = vadd.f32 %v2443_v53, %v2385_v54 }
 0x5f8   : > { %v2561_v7 = vpop.f32.mrb[64].mxu0 }
 0x5f9   : > { %v2497_v5 = vpop.f32.mrb[60].mxu1  ;;  %v2563_v9 = vpop.f32.mrb[65].mxu0 }
 0x5fa   : > { %v2504_v37 = vadd.f32 %v2497_v5, %v2448_v3  ;;  %v2499_v8 = vpop.f32.mrb[61].mxu1  ;;  %v2565_v12 = vpop.f32.mrb[66].mxu0 }
 0x5fb   : > { %v2505_v10 = vadd.f32 %v2499_v8, %v2449_v4  ;;  %v2501_v0 = vpop.f32.mrb[62].mxu1  ;;  %v2566_v15 = vpop.f32.mrb[67].mxu0 }
 0x5fc   : > { %v2568_v13 = vadd.f32 %v2561_v7, %v2504_v37  ;;  %v2502_v14 = vpop.f32.mrb[63].mxu1 }
 0x5fd   : > { %v2569_v63 = vadd.f32 %v2563_v9, %v2505_v10 }
 0x600   : > { %v2689_v11 = vpop.f32.mrb[68].mxu0 }
 0x601   : > { %v2625_v17 = vpop.f32.mrb[64].mxu1  ;;  %v2691_v18 = vpop.f32.mrb[69].mxu0 }
 0x602   : > { %v2632_v60 = vadd.f32 %v2625_v17, %v2568_v13  ;;  %v2627_v57 = vpop.f32.mrb[65].mxu1  ;;  %v2693_v43 = vpop.f32.mrb[70].mxu0 }
 0x603   : > { %v2633_v58 = vadd.f32 %v2627_v57, %v2569_v63  ;;  %v2629_v19 = vpop.f32.mrb[66].mxu1  ;;  %v2694_v59 = vpop.f32.mrb[71].mxu0 }
 0x604   : > { %v2696_v20 = vadd.f32 %v2689_v11, %v2632_v60  ;;  %v2630_v21 = vpop.f32.mrb[67].mxu1 }
 0x605   : > { %v2697_v22 = vadd.f32 %v2691_v18, %v2633_v58 }
 0x609   : > { %v2753_v45 = vpop.f32.mrb[68].mxu1 }
 0x60a   : > { %v2760_v23 = vadd.f32 %v2753_v45, %v2696_v20  ;;  %v2755_v24 = vpop.f32.mrb[69].mxu1 }
 0x60b   : > { %v2761_v26 = vadd.f32 %v2755_v24, %v2697_v22  ;;  %v2757_v47 = vpop.f32.mrb[70].mxu1 }
 0x60c   : > { %v2768_v39 = vadd.f32 %v2766_v2, %v2760_v23  ;;  %v2758_v28 = vpop.f32.mrb[71].mxu1 }
 0x60d   : > { %v2769_v16 = vadd.f32 %v2766_v2, %v2761_v26 }
 0x60e   : > { %v2770_v32 = vmax.f32 %v2768_v39, 0.0 }
 0x60f   : > { %v2771_v44 = vmax.f32 %v2769_v16, 0.0 }
 0x610   : > { %v2772_v6 = vadd.f32 %v2770_v32, %v3805_v40 }
 0x611   : > { %v2773_v30 = vadd.f32 %v2771_v44, %v3807_v27 }
 0x612   : > { %v2774_v33 = vmax.f32 %v2772_v6, 0.0 }
 0x613   : > { %v2775_v55 = vmax.f32 %v2773_v30, 0.0 }
 0x615   : > { %v2778_v31 = vcombine.low %v2774_v33, %v2775_v55 }
 0x617   : > { %2780 = vst [vmem:[%s332_s17] sm:$0xff] %v2778_v31 }
 0x618 PF: > { %s19_s30 = sadd.s32 1, %s3139_s30  }
 0x619   : > { %p16_p4 = scmp.ge.s32.totalorder %s19_s30, 4  }
 0x61b   :  { %18 = sbr.rel (!%p16_p4) target bundleno = 1 (0x1), region = 118 }

</bundles_post_ra>
